<compile_context>
chip_gen: v7x
topology: tpu7x:2x2x1
jax: 0.10.0
libtpu: 0.0.40
codegen_flags: <defaults>
</compile_context>

<pallas_src>
import functools
import math

import jax
import jax.numpy as jnp
from jax import lax
from jax.experimental import pallas as pl
from jax.experimental.pallas import tpu as pltpu

_NEG = -1e30  # finite "-inf" stand-in (avoids 0 * inf = NaN inside masked reductions)


def _col_to_row(col, n):
    """[n,1] -> [1,n] orientation flip via identity-masked sublane reduce.

    # TODO(synk): replace with a plain jnp.transpose once Mosaic relayout of
    # degenerate [N,1] tiles is guaranteed; this keeps one O(N^2) VPU multiply
    # per block (cheap at these N, and the iotas are regenerated inline so no
    # persistent [N,N] slab is held across the unrolled block loop).
    """
    ii = lax.broadcasted_iota(jnp.int32, (n, n), 0)
    jj = lax.broadcasted_iota(jnp.int32, (n, n), 1)
    eye = (ii == jj).astype(col.dtype)
    return jnp.sum(eye * col, axis=0, keepdims=True)


# ------------------------------ fused kernel --------------------------------

def sag_fused_kernel(adj_ref, x_ref, seq_ref, convw_ref, small_ref,
                     wl1_ref, wl2_ref, wl3_ref, mlpb_ref, o_ref,
                     *, N, hid, hid2, out_pad, seq_dim, ks):
    """Entire SAGNetworkHierarchical forward for ONE graph of the batch grid.

    All intermediates (mask, degree scale, H, score, readout accumulators) live in
    vregs/VMEM; only the final [1, out_pad] logits row is written.
    NOTE: assumes the adjacency is symmetric (undirected graph with self-loops),
    which the DGL reference also relies on for norm='both'.
    """
    f32 = jnp.float32
    bf16 = jnp.bfloat16

    adj = adj_ref[...]                       # [N, N] f32 — exact score/degree path
    adj_bf = adj.astype(bf16)                # bf16 copy for the feature matmuls
    feat = x_ref[...]                        # [N, hid] f32 (in_dim zero-padded)

    mask_col = jnp.ones((N, 1), f32)         # active-node mask (column form only)
    acc_avg = jnp.zeros((1, hid), f32)       # running sum of per-block avg readouts
    acc_max = jnp.zeros((1, hid), f32)       # running sum of per-block max readouts

    for i, k in enumerate(ks):               # static unroll; k = ceil(ratio * n_active)
        w_i = convw_ref[i]                   # [hid, hid] bf16
        sm = small_ref[i]                    # [3, hid]  f32
        b = sm[0:1, :]                       # [1, hid]  conv bias
        ws_row = sm[1:2, :]                  # [1, hid]  score GraphConv weight (row)
        bs = sm[2:3, 0:1]                    # [1, 1]    score GraphConv bias

        # --- GraphConv (norm='both', clamp(deg,1)) on the masked subgraph --------
        # Degree as an MXU matvec (adj is already staged for the agg matmul).
        deg_col = jnp.dot(adj, mask_col, preferred_element_type=f32)       # [N,1]
        scale_col = mask_col * lax.rsqrt(jnp.maximum(deg_col, 1.0))        # [N,1]

        xw = jnp.dot(feat.astype(bf16), w_i, preferred_element_type=f32)   # [N,hid]
        agg = jnp.dot(adj_bf, (scale_col * xw).astype(bf16),
                      preferred_element_type=f32)                          # [N,hid]
        h = jnp.maximum(scale_col * agg + b, 0.0) * mask_col               # relu; removed nodes stay 0

        # --- SAGPool score GraphConv (hid -> 1), f32, propagation on the MXU -----
        hw_col = jnp.sum(h * ws_row, axis=1, keepdims=True)                # [N,1]
        v_col = scale_col * hw_col                                         # [N,1]
        u_col = jnp.dot(adj, v_col, preferred_element_type=f32)            # [N,1]  A @ v (MXU)
        score_col = scale_col * u_col + bs                                 # [N,1]

        # --- in-kernel exact top-k via rank (lowest-index tie-break = lax.top_k) --
        sc_col = jnp.where(mask_col > 0.0, score_col, _NEG)                # [N,1]
        sc_row = _col_to_row(sc_col, N)                                    # [1,N]
        ii = lax.broadcasted_iota(jnp.int32, (N, N), 0)
        jj = lax.broadcasted_iota(jnp.int32, (N, N), 1)
        beats = ((sc_row > sc_col) | ((sc_row == sc_col) & (jj < ii))).astype(f32)
        rank_col = jnp.sum(beats, axis=1, keepdims=True)                   # [N,1]
        sel_col = (rank_col < float(k)).astype(f32)                        # exactly k ones

        # --- tanh gating + hierarchical [avg || max] readout ----------------------
        gated = h * (jnp.tanh(score_col) * sel_col)                        # [N,hid]
        acc_avg = acc_avg + jnp.sum(gated, axis=0, keepdims=True) * (1.0 / float(k))
        acc_max = acc_max + jnp.max(jnp.where(sel_col > 0.0, gated, _NEG),
                                    axis=0, keepdims=True)

        feat = gated
        mask_col = sel_col

    # --- MLP head: lin1 -> relu -> (dropout) -> lin2 -> relu -> lin3 -------------
    # cat([avg_acc, max_acc, sequence_feature]) @ W1 done as three split matmuls.
    h1 = (jnp.dot(acc_avg.astype(jnp.bfloat16), wl1_ref[0:hid, :],
                  preferred_element_type=f32)
          + jnp.dot(acc_max.astype(jnp.bfloat16), wl1_ref[hid:2 * hid, :],
                    preferred_element_type=f32)
          + jnp.dot(seq_ref[...], wl1_ref[2 * hid:2 * hid + seq_dim, :],
                    preferred_element_type=f32)
          + mlpb_ref[0:1, 0:hid])
    h1 = jnp.maximum(h1, 0.0)
    # TODO(synk): F.dropout applied as inference-mode identity (training=False).
    h2 = (jnp.dot(h1.astype(jnp.bfloat16), wl2_ref[...], preferred_element_type=f32)
          + mlpb_ref[1:2, 0:hid2])
    h2 = jnp.maximum(h2, 0.0)
    o_ref[...] = (jnp.dot(h2.astype(jnp.bfloat16), wl3_ref[...],
                          preferred_element_type=f32)
                  + mlpb_ref[2:3, 0:out_pad])                              # [1, out_pad] lane-dense


# ------------------------------ parameters ----------------------------------

def init_params(key, in_dim, hid_dim, out_dim, num_convs):
    def dense(k, fan_in, fan_out):
        k1, k2 = jax.random.split(k)
        bound = 1.0 / math.sqrt(fan_in)
        w = jax.random.uniform(k1, (fan_in, fan_out), jnp.float32, -bound, bound)
        b = jax.random.uniform(k2, (1, fan_out), jnp.float32, -bound, bound)
        return w, b

    keys = jax.random.split(key, 2 * num_convs + 3)
    params = {"convpools": []}
    for i in range(num_convs):
        din = in_dim if i == 0 else hid_dim
        w, b = dense(keys[2 * i], din, hid_dim)
        ws, bs = dense(keys[2 * i + 1], hid_dim, 1)
        params["convpools"].append({"w": w, "b": b, "ws": ws, "bs": bs})
    params["lin1"] = dense(keys[-3], hid_dim * 2 + 1024, hid_dim)
    params["lin2"] = dense(keys[-2], hid_dim, hid_dim // 2)
    params["lin3"] = dense(keys[-1], hid_dim // 2, out_dim)
    return params


# ------------------------------ forward pass ---------------------------------

@functools.partial(jax.jit, static_argnames=("pool_ratio",))
def sag_network_forward(params, adj_raw, node_feat, seq_feat, *, pool_ratio=0.5):
    """Batched forward: adj_raw [B,N,N], node_feat [B,N,in_dim], seq_feat [B,1024]."""
    f32, bf16 = jnp.float32, jnp.bfloat16
    B, N, _ = adj_raw.shape
    in_dim = node_feat.shape[-1]
    hid = params["convpools"][0]["w"].shape[1]
    hid2 = params["lin2"][0].shape[1]
    out_dim = params["lin3"][0].shape[1]
    seq_dim = seq_feat.shape[-1]
    num_convs = len(params["convpools"])
    assert in_dim <= hid, "weight packing assumes in_dim <= hid"
    assert params["lin1"][0].shape[0] == 2 * hid + seq_dim

    out_pad = max(128, ((out_dim + 127) // 128) * 128)   # lane-dense output width
    lanes_b = max(hid, out_pad)                          # MLP-bias slab lane width

    # Static per-block top-k sizes (pool_ratio and N are static).
    ks, n = [], N
    for _ in range(num_convs):
        k = max(1, int(math.ceil(pool_ratio * n)))
        ks.append(k)
        n = k

    # Pack: features padded to hid; conv weights as a uniform bf16 [hid,hid] slab;
    # small per-block constants in one [num_convs, 3, hid] f32 array; MLP biases
    # in [3, lanes_b]; lin3 zero-padded to out_pad lanes for a lane-dense store.
    x0 = jnp.zeros((B, N, hid), f32).at[:, :, :in_dim].set(node_feat.astype(f32))
    seq_b = seq_feat.reshape(B, 1, seq_dim).astype(bf16)

    conv_w, small = [], []
    for blk in params["convpools"]:
        w = blk["w"]
        conv_w.append(jnp.zeros((hid, hid), f32).at[:w.shape[0], :].set(w))
        bs_row = jnp.zeros((1, hid), f32).at[0, 0].set(blk["bs"][0, 0])
        small.append(jnp.concatenate([blk["b"], blk["ws"].reshape(1, hid), bs_row], 0))
    conv_w = jnp.stack(conv_w).astype(bf16)      # [num_convs, hid, hid] bf16
    small = jnp.stack(small)                     # [num_convs, 3, hid]  f32

    (w1, b1), (w2, b2), (w3, b3) = params["lin1"], params["lin2"], params["lin3"]
    w1b = w1.astype(bf16)
    w2b = w2.astype(bf16)
    w3p = jnp.zeros((hid2, out_pad), f32).at[:, :out_dim].set(w3).astype(bf16)
    mlpb = jnp.zeros((3, lanes_b), f32)
    mlpb = mlpb.at[0, :hid].set(b1[0])
    mlpb = mlpb.at[1, :hid2].set(b2[0])
    mlpb = mlpb.at[2, :out_dim].set(b3[0])

    kernel = functools.partial(sag_fused_kernel, N=N, hid=hid, hid2=hid2,
                               out_pad=out_pad, seq_dim=seq_dim, ks=tuple(ks))

    # Per-graph blocks indexed by the batch grid id; weights use a constant
    # index_map so they stay VMEM-resident across the whole batch.
    def batch_spec(shape):
        return pl.BlockSpec((None,) + shape, lambda b: (b,) + (0,) * len(shape))

    def resident_spec(shape):
        return pl.BlockSpec(shape, lambda b: (0,) * len(shape))

    # TODO(synk): for large N (v7x: 64 MiB VMEM), tile adj over rows with an extra
    # grid axis and set pltpu.CompilerParams(vmem_limit_bytes=...); whole-graph VMEM
    # residency is the right call at these sizes.
    out = pl.pallas_call(
        kernel,
        grid=(B,),
        out_shape=jax.ShapeDtypeStruct((B, 1, out_pad), f32),
        in_specs=[
            batch_spec((N, N)),                    # adjacency
            batch_spec((N, hid)),                  # node features (padded)
            batch_spec((1, seq_dim)),              # sequence feature (bf16)
            resident_spec((num_convs, hid, hid)),  # conv weights (bf16)
            resident_spec((num_convs, 3, hid)),    # conv bias / score w / score b
            resident_spec((2 * hid + seq_dim, hid)),  # lin1 (bf16)
            resident_spec((hid, hid2)),            # lin2 (bf16)
            resident_spec((hid2, out_pad)),        # lin3 padded (bf16)
            resident_spec((3, lanes_b)),           # MLP biases
        ],
        out_specs=batch_spec((1, out_pad)),
        compiler_params=pltpu.CompilerParams(
            dimension_semantics=("parallel",)),    # v7x: split batch across both TCs
    )(adj_raw.astype(f32), x0, seq_b, conv_w, small, w1b, w2b, w3p, mlpb)

    return out[:, 0, :out_dim]


# ---------------------------------- main -------------------------------------

if __name__ == "__main__":
    B = 4                       # graphs per batch (grid axis, "parallel")
    IN_DIM, HID_DIM, OUT_DIM = 8, 32, 4
    NUM_CONVS, POOL_RATIO = 3, 0.5
    N = 16                      # nodes per graph
    SEQ_DIM = 1024              # sequence_feature dim implied by lin1 (hid*2 + 1024)

    key = jax.random.PRNGKey(0)
    k_params, k_feat, k_adj, k_seq = jax.random.split(key, 4)

    params = init_params(k_params, IN_DIM, HID_DIM, OUT_DIM, NUM_CONVS)

    node_feat = jax.random.normal(k_feat, (B, N, IN_DIM), jnp.float32)
    # Random undirected graphs: symmetric adjacency with self-loops.
    a = (jax.random.uniform(k_adj, (B, N, N)) < 0.3).astype(jnp.float32)
    adj_raw = jnp.maximum(a, jnp.swapaxes(a, -1, -2))
    adj_raw = jnp.maximum(adj_raw, jnp.eye(N, dtype=jnp.float32)[None])
    seq_feat = jax.random.normal(k_seq, (B, SEQ_DIM), jnp.float32)

    out = sag_network_forward(params, adj_raw, node_feat, seq_feat,
                              pool_ratio=POOL_RATIO)
    out = jax.block_until_ready(out)
    assert out.shape == (B, OUT_DIM)
    assert bool(jnp.all(jnp.isfinite(out)))
    print("KERNEL_OK")
</pallas_src>

<mosaic_0001>
module attributes {stable_mosaic.version = 11 : i64} {
  func.func @sag_fused_kernel(%arg0: i32, %arg1: memref<1x16x16xf32, #tpu.memory_space<vmem>>, %arg2: memref<1x16x32xf32, #tpu.memory_space<vmem>>, %arg3: memref<1x1x1024xbf16, #tpu.memory_space<vmem>>, %arg4: memref<3x32x32xbf16, #tpu.memory_space<vmem>>, %arg5: memref<3x3x32xf32, #tpu.memory_space<vmem>>, %arg6: memref<1088x32xbf16, #tpu.memory_space<vmem>>, %arg7: memref<32x16xbf16, #tpu.memory_space<vmem>>, %arg8: memref<16x128xbf16, #tpu.memory_space<vmem>>, %arg9: memref<3x128xf32, #tpu.memory_space<vmem>>, %arg10: memref<1x1x128xf32, #tpu.memory_space<vmem>>) attributes {dimension_semantics = [#tpu.dimension_semantics<parallel>], iteration_bounds = array<i64: 4>, scalar_prefetch = 0 : i64, scratch_operands = 0 : i64, tpu.core_type = #tpu.core_type<tc>, window_params = [{transform_indices = @transform_0, window_bounds = array<i64: 1, 16, 16>}, {transform_indices = @transform_1, window_bounds = array<i64: 1, 16, 32>}, {transform_indices = @transform_2, window_bounds = array<i64: 1, 1, 1024>}, {pipeline_mode = #tpu.pipeline_mode<synchronous>, transform_indices = @transform_3, window_bounds = array<i64: 3, 32, 32>}, {pipeline_mode = #tpu.pipeline_mode<synchronous>, transform_indices = @transform_4, window_bounds = array<i64: 3, 3, 32>}, {pipeline_mode = #tpu.pipeline_mode<synchronous>, transform_indices = @transform_5, window_bounds = array<i64: 1088, 32>}, {pipeline_mode = #tpu.pipeline_mode<synchronous>, transform_indices = @transform_6, window_bounds = array<i64: 32, 16>}, {pipeline_mode = #tpu.pipeline_mode<synchronous>, transform_indices = @transform_7, window_bounds = array<i64: 16, 128>}, {pipeline_mode = #tpu.pipeline_mode<synchronous>, transform_indices = @transform_8, window_bounds = array<i64: 3, 128>}, {transform_indices = @transform_9, window_bounds = array<i64: 1, 1, 128>}]} {
    %c0 = arith.constant 0 : index
    %c0_0 = arith.constant 0 : index
    %c0_1 = arith.constant 0 : index
    %0 = vector.load %arg1[%c0, %c0_0, %c0_1] : memref<1x16x16xf32, #tpu.memory_space<vmem>>, vector<1x16x16xf32>
    %1 = vector.shape_cast %0 : vector<1x16x16xf32> to vector<16x16xf32>
    %2 = arith.truncf %1 : vector<16x16xf32> to vector<16x16xbf16>
    %c0_2 = arith.constant 0 : index
    %c0_3 = arith.constant 0 : index
    %c0_4 = arith.constant 0 : index
    %3 = vector.load %arg2[%c0_2, %c0_3, %c0_4] : memref<1x16x32xf32, #tpu.memory_space<vmem>>, vector<1x16x32xf32>
    %4 = vector.shape_cast %3 : vector<1x16x32xf32> to vector<16x32xf32>
    %cst = arith.constant 1.000000e+00 : f32
    %5 = vector.broadcast %cst : f32 to vector<16x1xf32>
    %cst_5 = arith.constant 0.000000e+00 : f32
    %6 = vector.broadcast %cst_5 : f32 to vector<1x32xf32>
    %cst_6 = arith.constant 0.000000e+00 : f32
    %7 = vector.broadcast %cst_6 : f32 to vector<1x32xf32>
    %c0_7 = arith.constant 0 : index
    %c0_8 = arith.constant 0 : index
    %c0_9 = arith.constant 0 : index
    %8 = vector.load %arg4[%c0_7, %c0_8, %c0_9] : memref<3x32x32xbf16, #tpu.memory_space<vmem>>, vector<1x32x32xbf16>
    %9 = vector.shape_cast %8 : vector<1x32x32xbf16> to vector<32x32xbf16>
    %c0_10 = arith.constant 0 : index
    %c0_11 = arith.constant 0 : index
    %c0_12 = arith.constant 0 : index
    %10 = vector.load %arg5[%c0_10, %c0_11, %c0_12] : memref<3x3x32xf32, #tpu.memory_space<vmem>>, vector<1x3x32xf32>
    %11 = vector.shape_cast %10 : vector<1x3x32xf32> to vector<3x32xf32>
    %12 = vector.extract_strided_slice %11 {offsets = [0, 0], sizes = [1, 32], strides = [1, 1]} : vector<3x32xf32> to vector<1x32xf32>
    %13 = vector.extract_strided_slice %11 {offsets = [1, 0], sizes = [1, 32], strides = [1, 1]} : vector<3x32xf32> to vector<1x32xf32>
    %14 = vector.extract_strided_slice %11 {offsets = [2, 0], sizes = [1, 1], strides = [1, 1]} : vector<3x32xf32> to vector<1x1xf32>
    %cst_13 = arith.constant dense<0.000000e+00> : vector<16x1xf32>
    %15 = tpu.matmul %1, %5, %cst_13 {dimension_numbers = #tpu.dot_dimension_numbers<[1], [0], [0], [1], [0, 0, 1, 1], [], []>} : vector<16x16xf32>, vector<16x1xf32>, vector<16x1xf32> -> vector<16x1xf32>
    %cst_14 = arith.constant 1.000000e+00 : f32
    %16 = vector.broadcast %cst_14 : f32 to vector<16x1xf32>
    %17 = arith.maximumf %15, %16 : vector<16x1xf32>
    %18 = math.rsqrt %17 : vector<16x1xf32>
    %19 = arith.mulf %5, %18 : vector<16x1xf32>
    %20 = arith.truncf %4 : vector<16x32xf32> to vector<16x32xbf16>
    %cst_15 = arith.constant dense<0.000000e+00> : vector<16x32xf32>
    %21 = tpu.matmul %20, %9, %cst_15 {dimension_numbers = #tpu.dot_dimension_numbers<[1], [0], [0], [1], [0, 0, 1, 1], [], []>} : vector<16x32xbf16>, vector<32x32xbf16>, vector<16x32xf32> -> vector<16x32xf32>
    %22 = vector.broadcast %19 : vector<16x1xf32> to vector<16x32xf32>
    %23 = arith.mulf %22, %21 : vector<16x32xf32>
    %24 = arith.truncf %23 : vector<16x32xf32> to vector<16x32xbf16>
    %cst_16 = arith.constant dense<0.000000e+00> : vector<16x32xf32>
    %25 = tpu.matmul %2, %24, %cst_16 {dimension_numbers = #tpu.dot_dimension_numbers<[1], [0], [0], [1], [0, 0, 1, 1], [], []>} : vector<16x16xbf16>, vector<16x32xbf16>, vector<16x32xf32> -> vector<16x32xf32>
    %26 = vector.broadcast %19 : vector<16x1xf32> to vector<16x32xf32>
    %27 = arith.mulf %26, %25 : vector<16x32xf32>
    %28 = vector.broadcast %12 : vector<1x32xf32> to vector<16x32xf32>
    %29 = arith.addf %27, %28 : vector<16x32xf32>
    %cst_17 = arith.constant 0.000000e+00 : f32
    %30 = vector.broadcast %cst_17 : f32 to vector<16x32xf32>
    %31 = arith.maximumf %29, %30 : vector<16x32xf32>
    %32 = vector.broadcast %5 : vector<16x1xf32> to vector<16x32xf32>
    %33 = arith.mulf %31, %32 : vector<16x32xf32>
    %34 = vector.broadcast %13 : vector<1x32xf32> to vector<16x32xf32>
    %35 = arith.mulf %33, %34 : vector<16x32xf32>
    %cst_18 = arith.constant dense<0.000000e+00> : vector<16xf32>
    %36 = vector.multi_reduction <add>, %35, %cst_18 [1] : vector<16x32xf32> to vector<16xf32>
    %37 = vector.shape_cast %36 : vector<16xf32> to vector<16x1xf32>
    %38 = arith.mulf %19, %37 : vector<16x1xf32>
    %cst_19 = arith.constant dense<0.000000e+00> : vector<16x1xf32>
    %39 = tpu.matmul %1, %38, %cst_19 {dimension_numbers = #tpu.dot_dimension_numbers<[1], [0], [0], [1], [0, 0, 1, 1], [], []>} : vector<16x16xf32>, vector<16x1xf32>, vector<16x1xf32> -> vector<16x1xf32>
    %40 = arith.mulf %19, %39 : vector<16x1xf32>
    %41 = vector.broadcast %14 : vector<1x1xf32> to vector<16x1xf32>
    %42 = arith.addf %40, %41 : vector<16x1xf32>
    %cst_20 = arith.constant 0.000000e+00 : f32
    %43 = vector.broadcast %cst_20 : f32 to vector<16x1xf32>
    %44 = arith.cmpf ogt, %5, %43 : vector<16x1xf32>
    %cst_21 = arith.constant -1.000000e+30 : f32
    %45 = vector.broadcast %cst_21 : f32 to vector<16x1xf32>
    %46 = arith.select %44, %42, %45 : vector<16x1xi1>, vector<16x1xf32>
    %47 = tpu.iota {dimensions = array<i32: 0>} : vector<16x16xi32>
    %48 = tpu.iota {dimensions = array<i32: 1>} : vector<16x16xi32>
    %49 = arith.cmpi eq, %47, %48 : vector<16x16xi32>
    %50 = arith.extui %49 : vector<16x16xi1> to vector<16x16xi32>
    %51 = arith.sitofp %50 : vector<16x16xi32> to vector<16x16xf32>
    %52 = vector.broadcast %46 : vector<16x1xf32> to vector<16x16xf32>
    %53 = arith.mulf %51, %52 : vector<16x16xf32>
    %cst_22 = arith.constant dense<0.000000e+00> : vector<16xf32>
    %54 = vector.multi_reduction <add>, %53, %cst_22 [0] : vector<16x16xf32> to vector<16xf32>
    %55 = vector.shape_cast %54 : vector<16xf32> to vector<1x16xf32>
    %56 = tpu.iota {dimensions = array<i32: 0>} : vector<16x16xi32>
    %57 = tpu.iota {dimensions = array<i32: 1>} : vector<16x16xi32>
    %58 = vector.broadcast %55 : vector<1x16xf32> to vector<16x16xf32>
    %59 = vector.broadcast %46 : vector<16x1xf32> to vector<16x16xf32>
    %60 = arith.cmpf ogt, %58, %59 : vector<16x16xf32>
    %61 = vector.broadcast %55 : vector<1x16xf32> to vector<16x16xf32>
    %62 = vector.broadcast %46 : vector<16x1xf32> to vector<16x16xf32>
    %63 = arith.cmpf oeq, %61, %62 : vector<16x16xf32>
    %64 = arith.cmpi slt, %57, %56 : vector<16x16xi32>
    %65 = arith.andi %63, %64 : vector<16x16xi1>
    %66 = arith.ori %60, %65 : vector<16x16xi1>
    %67 = arith.extui %66 : vector<16x16xi1> to vector<16x16xi32>
    %68 = arith.sitofp %67 : vector<16x16xi32> to vector<16x16xf32>
    %cst_23 = arith.constant dense<0.000000e+00> : vector<16xf32>
    %69 = vector.multi_reduction <add>, %68, %cst_23 [1] : vector<16x16xf32> to vector<16xf32>
    %70 = vector.shape_cast %69 : vector<16xf32> to vector<16x1xf32>
    %cst_24 = arith.constant 8.000000e+00 : f32
    %71 = vector.broadcast %cst_24 : f32 to vector<16x1xf32>
    %72 = arith.cmpf olt, %70, %71 : vector<16x1xf32>
    %73 = arith.extui %72 : vector<16x1xi1> to vector<16x1xi32>
    %74 = arith.sitofp %73 : vector<16x1xi32> to vector<16x1xf32>
    %75 = math.tanh %42 : vector<16x1xf32>
    %76 = arith.mulf %75, %74 : vector<16x1xf32>
    %77 = vector.broadcast %76 : vector<16x1xf32> to vector<16x32xf32>
    %78 = arith.mulf %33, %77 : vector<16x32xf32>
    %cst_25 = arith.constant dense<0.000000e+00> : vector<32xf32>
    %79 = vector.multi_reduction <add>, %78, %cst_25 [0] : vector<16x32xf32> to vector<32xf32>
    %80 = vector.shape_cast %79 : vector<32xf32> to vector<1x32xf32>
    %cst_26 = arith.constant 1.250000e-01 : f32
    %81 = vector.broadcast %cst_26 : f32 to vector<1x32xf32>
    %82 = arith.mulf %80, %81 : vector<1x32xf32>
    %83 = arith.addf %6, %82 : vector<1x32xf32>
    %cst_27 = arith.constant 0.000000e+00 : f32
    %84 = vector.broadcast %cst_27 : f32 to vector<16x1xf32>
    %85 = arith.cmpf ogt, %74, %84 : vector<16x1xf32>
    %cst_28 = arith.constant -1.000000e+30 : f32
    %86 = vector.shape_cast %85 : vector<16x1xi1> to vector<16x1xi1>
    %87 = vector.broadcast %86 : vector<16x1xi1> to vector<16x32xi1>
    %88 = vector.broadcast %cst_28 : f32 to vector<16x32xf32>
    %89 = arith.select %87, %78, %88 : vector<16x32xi1>, vector<16x32xf32>
    %cst_29 = arith.constant dense<0xFF800000> : vector<32xf32>
    %90 = vector.multi_reduction <maximumf>, %89, %cst_29 [0] : vector<16x32xf32> to vector<32xf32>
    %91 = vector.shape_cast %90 : vector<32xf32> to vector<1x32xf32>
    %92 = arith.addf %7, %91 : vector<1x32xf32>
    %c1 = arith.constant 1 : index
    %c0_30 = arith.constant 0 : index
    %c0_31 = arith.constant 0 : index
    %93 = vector.load %arg4[%c1, %c0_30, %c0_31] : memref<3x32x32xbf16, #tpu.memory_space<vmem>>, vector<1x32x32xbf16>
    %94 = vector.shape_cast %93 : vector<1x32x32xbf16> to vector<32x32xbf16>
    %c1_32 = arith.constant 1 : index
    %c0_33 = arith.constant 0 : index
    %c0_34 = arith.constant 0 : index
    %95 = vector.load %arg5[%c1_32, %c0_33, %c0_34] : memref<3x3x32xf32, #tpu.memory_space<vmem>>, vector<1x3x32xf32>
    %96 = vector.shape_cast %95 : vector<1x3x32xf32> to vector<3x32xf32>
    %97 = vector.extract_strided_slice %96 {offsets = [0, 0], sizes = [1, 32], strides = [1, 1]} : vector<3x32xf32> to vector<1x32xf32>
    %98 = vector.extract_strided_slice %96 {offsets = [1, 0], sizes = [1, 32], strides = [1, 1]} : vector<3x32xf32> to vector<1x32xf32>
    %99 = vector.extract_strided_slice %96 {offsets = [2, 0], sizes = [1, 1], strides = [1, 1]} : vector<3x32xf32> to vector<1x1xf32>
    %cst_35 = arith.constant dense<0.000000e+00> : vector<16x1xf32>
    %100 = tpu.matmul %1, %74, %cst_35 {dimension_numbers = #tpu.dot_dimension_numbers<[1], [0], [0], [1], [0, 0, 1, 1], [], []>} : vector<16x16xf32>, vector<16x1xf32>, vector<16x1xf32> -> vector<16x1xf32>
    %cst_36 = arith.constant 1.000000e+00 : f32
    %101 = vector.broadcast %cst_36 : f32 to vector<16x1xf32>
    %102 = arith.maximumf %100, %101 : vector<16x1xf32>
    %103 = math.rsqrt %102 : vector<16x1xf32>
    %104 = arith.mulf %74, %103 : vector<16x1xf32>
    %105 = arith.truncf %78 : vector<16x32xf32> to vector<16x32xbf16>
    %cst_37 = arith.constant dense<0.000000e+00> : vector<16x32xf32>
    %106 = tpu.matmul %105, %94, %cst_37 {dimension_numbers = #tpu.dot_dimension_numbers<[1], [0], [0], [1], [0, 0, 1, 1], [], []>} : vector<16x32xbf16>, vector<32x32xbf16>, vector<16x32xf32> -> vector<16x32xf32>
    %107 = vector.broadcast %104 : vector<16x1xf32> to vector<16x32xf32>
    %108 = arith.mulf %107, %106 : vector<16x32xf32>
    %109 = arith.truncf %108 : vector<16x32xf32> to vector<16x32xbf16>
    %cst_38 = arith.constant dense<0.000000e+00> : vector<16x32xf32>
    %110 = tpu.matmul %2, %109, %cst_38 {dimension_numbers = #tpu.dot_dimension_numbers<[1], [0], [0], [1], [0, 0, 1, 1], [], []>} : vector<16x16xbf16>, vector<16x32xbf16>, vector<16x32xf32> -> vector<16x32xf32>
    %111 = vector.broadcast %104 : vector<16x1xf32> to vector<16x32xf32>
    %112 = arith.mulf %111, %110 : vector<16x32xf32>
    %113 = vector.broadcast %97 : vector<1x32xf32> to vector<16x32xf32>
    %114 = arith.addf %112, %113 : vector<16x32xf32>
    %cst_39 = arith.constant 0.000000e+00 : f32
    %115 = vector.broadcast %cst_39 : f32 to vector<16x32xf32>
    %116 = arith.maximumf %114, %115 : vector<16x32xf32>
    %117 = vector.broadcast %74 : vector<16x1xf32> to vector<16x32xf32>
    %118 = arith.mulf %116, %117 : vector<16x32xf32>
    %119 = vector.broadcast %98 : vector<1x32xf32> to vector<16x32xf32>
    %120 = arith.mulf %118, %119 : vector<16x32xf32>
    %cst_40 = arith.constant dense<0.000000e+00> : vector<16xf32>
    %121 = vector.multi_reduction <add>, %120, %cst_40 [1] : vector<16x32xf32> to vector<16xf32>
    %122 = vector.shape_cast %121 : vector<16xf32> to vector<16x1xf32>
    %123 = arith.mulf %104, %122 : vector<16x1xf32>
    %cst_41 = arith.constant dense<0.000000e+00> : vector<16x1xf32>
    %124 = tpu.matmul %1, %123, %cst_41 {dimension_numbers = #tpu.dot_dimension_numbers<[1], [0], [0], [1], [0, 0, 1, 1], [], []>} : vector<16x16xf32>, vector<16x1xf32>, vector<16x1xf32> -> vector<16x1xf32>
    %125 = arith.mulf %104, %124 : vector<16x1xf32>
    %126 = vector.broadcast %99 : vector<1x1xf32> to vector<16x1xf32>
    %127 = arith.addf %125, %126 : vector<16x1xf32>
    %cst_42 = arith.constant 0.000000e+00 : f32
    %128 = vector.broadcast %cst_42 : f32 to vector<16x1xf32>
    %129 = arith.cmpf ogt, %74, %128 : vector<16x1xf32>
    %cst_43 = arith.constant -1.000000e+30 : f32
    %130 = vector.broadcast %cst_43 : f32 to vector<16x1xf32>
    %131 = arith.select %129, %127, %130 : vector<16x1xi1>, vector<16x1xf32>
    %132 = tpu.iota {dimensions = array<i32: 0>} : vector<16x16xi32>
    %133 = tpu.iota {dimensions = array<i32: 1>} : vector<16x16xi32>
    %134 = arith.cmpi eq, %132, %133 : vector<16x16xi32>
    %135 = arith.extui %134 : vector<16x16xi1> to vector<16x16xi32>
    %136 = arith.sitofp %135 : vector<16x16xi32> to vector<16x16xf32>
    %137 = vector.broadcast %131 : vector<16x1xf32> to vector<16x16xf32>
    %138 = arith.mulf %136, %137 : vector<16x16xf32>
    %cst_44 = arith.constant dense<0.000000e+00> : vector<16xf32>
    %139 = vector.multi_reduction <add>, %138, %cst_44 [0] : vector<16x16xf32> to vector<16xf32>
    %140 = vector.shape_cast %139 : vector<16xf32> to vector<1x16xf32>
    %141 = tpu.iota {dimensions = array<i32: 0>} : vector<16x16xi32>
    %142 = tpu.iota {dimensions = array<i32: 1>} : vector<16x16xi32>
    %143 = vector.broadcast %140 : vector<1x16xf32> to vector<16x16xf32>
    %144 = vector.broadcast %131 : vector<16x1xf32> to vector<16x16xf32>
    %145 = arith.cmpf ogt, %143, %144 : vector<16x16xf32>
    %146 = vector.broadcast %140 : vector<1x16xf32> to vector<16x16xf32>
    %147 = vector.broadcast %131 : vector<16x1xf32> to vector<16x16xf32>
    %148 = arith.cmpf oeq, %146, %147 : vector<16x16xf32>
    %149 = arith.cmpi slt, %142, %141 : vector<16x16xi32>
    %150 = arith.andi %148, %149 : vector<16x16xi1>
    %151 = arith.ori %145, %150 : vector<16x16xi1>
    %152 = arith.extui %151 : vector<16x16xi1> to vector<16x16xi32>
    %153 = arith.sitofp %152 : vector<16x16xi32> to vector<16x16xf32>
    %cst_45 = arith.constant dense<0.000000e+00> : vector<16xf32>
    %154 = vector.multi_reduction <add>, %153, %cst_45 [1] : vector<16x16xf32> to vector<16xf32>
    %155 = vector.shape_cast %154 : vector<16xf32> to vector<16x1xf32>
    %cst_46 = arith.constant 4.000000e+00 : f32
    %156 = vector.broadcast %cst_46 : f32 to vector<16x1xf32>
    %157 = arith.cmpf olt, %155, %156 : vector<16x1xf32>
    %158 = arith.extui %157 : vector<16x1xi1> to vector<16x1xi32>
    %159 = arith.sitofp %158 : vector<16x1xi32> to vector<16x1xf32>
    %160 = math.tanh %127 : vector<16x1xf32>
    %161 = arith.mulf %160, %159 : vector<16x1xf32>
    %162 = vector.broadcast %161 : vector<16x1xf32> to vector<16x32xf32>
    %163 = arith.mulf %118, %162 : vector<16x32xf32>
    %cst_47 = arith.constant dense<0.000000e+00> : vector<32xf32>
    %164 = vector.multi_reduction <add>, %163, %cst_47 [0] : vector<16x32xf32> to vector<32xf32>
    %165 = vector.shape_cast %164 : vector<32xf32> to vector<1x32xf32>
    %cst_48 = arith.constant 2.500000e-01 : f32
    %166 = vector.broadcast %cst_48 : f32 to vector<1x32xf32>
    %167 = arith.mulf %165, %166 : vector<1x32xf32>
    %168 = arith.addf %83, %167 : vector<1x32xf32>
    %cst_49 = arith.constant 0.000000e+00 : f32
    %169 = vector.broadcast %cst_49 : f32 to vector<16x1xf32>
    %170 = arith.cmpf ogt, %159, %169 : vector<16x1xf32>
    %cst_50 = arith.constant -1.000000e+30 : f32
    %171 = vector.shape_cast %170 : vector<16x1xi1> to vector<16x1xi1>
    %172 = vector.broadcast %171 : vector<16x1xi1> to vector<16x32xi1>
    %173 = vector.broadcast %cst_50 : f32 to vector<16x32xf32>
    %174 = arith.select %172, %163, %173 : vector<16x32xi1>, vector<16x32xf32>
    %cst_51 = arith.constant dense<0xFF800000> : vector<32xf32>
    %175 = vector.multi_reduction <maximumf>, %174, %cst_51 [0] : vector<16x32xf32> to vector<32xf32>
    %176 = vector.shape_cast %175 : vector<32xf32> to vector<1x32xf32>
    %177 = arith.addf %92, %176 : vector<1x32xf32>
    %c2 = arith.constant 2 : index
    %c0_52 = arith.constant 0 : index
    %c0_53 = arith.constant 0 : index
    %178 = vector.load %arg4[%c2, %c0_52, %c0_53] : memref<3x32x32xbf16, #tpu.memory_space<vmem>>, vector<1x32x32xbf16>
    %179 = vector.shape_cast %178 : vector<1x32x32xbf16> to vector<32x32xbf16>
    %c2_54 = arith.constant 2 : index
    %c0_55 = arith.constant 0 : index
    %c0_56 = arith.constant 0 : index
    %180 = vector.load %arg5[%c2_54, %c0_55, %c0_56] : memref<3x3x32xf32, #tpu.memory_space<vmem>>, vector<1x3x32xf32>
    %181 = vector.shape_cast %180 : vector<1x3x32xf32> to vector<3x32xf32>
    %182 = vector.extract_strided_slice %181 {offsets = [0, 0], sizes = [1, 32], strides = [1, 1]} : vector<3x32xf32> to vector<1x32xf32>
    %183 = vector.extract_strided_slice %181 {offsets = [1, 0], sizes = [1, 32], strides = [1, 1]} : vector<3x32xf32> to vector<1x32xf32>
    %184 = vector.extract_strided_slice %181 {offsets = [2, 0], sizes = [1, 1], strides = [1, 1]} : vector<3x32xf32> to vector<1x1xf32>
    %cst_57 = arith.constant dense<0.000000e+00> : vector<16x1xf32>
    %185 = tpu.matmul %1, %159, %cst_57 {dimension_numbers = #tpu.dot_dimension_numbers<[1], [0], [0], [1], [0, 0, 1, 1], [], []>} : vector<16x16xf32>, vector<16x1xf32>, vector<16x1xf32> -> vector<16x1xf32>
    %cst_58 = arith.constant 1.000000e+00 : f32
    %186 = vector.broadcast %cst_58 : f32 to vector<16x1xf32>
    %187 = arith.maximumf %185, %186 : vector<16x1xf32>
    %188 = math.rsqrt %187 : vector<16x1xf32>
    %189 = arith.mulf %159, %188 : vector<16x1xf32>
    %190 = arith.truncf %163 : vector<16x32xf32> to vector<16x32xbf16>
    %cst_59 = arith.constant dense<0.000000e+00> : vector<16x32xf32>
    %191 = tpu.matmul %190, %179, %cst_59 {dimension_numbers = #tpu.dot_dimension_numbers<[1], [0], [0], [1], [0, 0, 1, 1], [], []>} : vector<16x32xbf16>, vector<32x32xbf16>, vector<16x32xf32> -> vector<16x32xf32>
    %192 = vector.broadcast %189 : vector<16x1xf32> to vector<16x32xf32>
    %193 = arith.mulf %192, %191 : vector<16x32xf32>
    %194 = arith.truncf %193 : vector<16x32xf32> to vector<16x32xbf16>
    %cst_60 = arith.constant dense<0.000000e+00> : vector<16x32xf32>
    %195 = tpu.matmul %2, %194, %cst_60 {dimension_numbers = #tpu.dot_dimension_numbers<[1], [0], [0], [1], [0, 0, 1, 1], [], []>} : vector<16x16xbf16>, vector<16x32xbf16>, vector<16x32xf32> -> vector<16x32xf32>
    %196 = vector.broadcast %189 : vector<16x1xf32> to vector<16x32xf32>
    %197 = arith.mulf %196, %195 : vector<16x32xf32>
    %198 = vector.broadcast %182 : vector<1x32xf32> to vector<16x32xf32>
    %199 = arith.addf %197, %198 : vector<16x32xf32>
    %cst_61 = arith.constant 0.000000e+00 : f32
    %200 = vector.broadcast %cst_61 : f32 to vector<16x32xf32>
    %201 = arith.maximumf %199, %200 : vector<16x32xf32>
    %202 = vector.broadcast %159 : vector<16x1xf32> to vector<16x32xf32>
    %203 = arith.mulf %201, %202 : vector<16x32xf32>
    %204 = vector.broadcast %183 : vector<1x32xf32> to vector<16x32xf32>
    %205 = arith.mulf %203, %204 : vector<16x32xf32>
    %cst_62 = arith.constant dense<0.000000e+00> : vector<16xf32>
    %206 = vector.multi_reduction <add>, %205, %cst_62 [1] : vector<16x32xf32> to vector<16xf32>
    %207 = vector.shape_cast %206 : vector<16xf32> to vector<16x1xf32>
    %208 = arith.mulf %189, %207 : vector<16x1xf32>
    %cst_63 = arith.constant dense<0.000000e+00> : vector<16x1xf32>
    %209 = tpu.matmul %1, %208, %cst_63 {dimension_numbers = #tpu.dot_dimension_numbers<[1], [0], [0], [1], [0, 0, 1, 1], [], []>} : vector<16x16xf32>, vector<16x1xf32>, vector<16x1xf32> -> vector<16x1xf32>
    %210 = arith.mulf %189, %209 : vector<16x1xf32>
    %211 = vector.broadcast %184 : vector<1x1xf32> to vector<16x1xf32>
    %212 = arith.addf %210, %211 : vector<16x1xf32>
    %cst_64 = arith.constant 0.000000e+00 : f32
    %213 = vector.broadcast %cst_64 : f32 to vector<16x1xf32>
    %214 = arith.cmpf ogt, %159, %213 : vector<16x1xf32>
    %cst_65 = arith.constant -1.000000e+30 : f32
    %215 = vector.broadcast %cst_65 : f32 to vector<16x1xf32>
    %216 = arith.select %214, %212, %215 : vector<16x1xi1>, vector<16x1xf32>
    %217 = tpu.iota {dimensions = array<i32: 0>} : vector<16x16xi32>
    %218 = tpu.iota {dimensions = array<i32: 1>} : vector<16x16xi32>
    %219 = arith.cmpi eq, %217, %218 : vector<16x16xi32>
    %220 = arith.extui %219 : vector<16x16xi1> to vector<16x16xi32>
    %221 = arith.sitofp %220 : vector<16x16xi32> to vector<16x16xf32>
    %222 = vector.broadcast %216 : vector<16x1xf32> to vector<16x16xf32>
    %223 = arith.mulf %221, %222 : vector<16x16xf32>
    %cst_66 = arith.constant dense<0.000000e+00> : vector<16xf32>
    %224 = vector.multi_reduction <add>, %223, %cst_66 [0] : vector<16x16xf32> to vector<16xf32>
    %225 = vector.shape_cast %224 : vector<16xf32> to vector<1x16xf32>
    %226 = tpu.iota {dimensions = array<i32: 0>} : vector<16x16xi32>
    %227 = tpu.iota {dimensions = array<i32: 1>} : vector<16x16xi32>
    %228 = vector.broadcast %225 : vector<1x16xf32> to vector<16x16xf32>
    %229 = vector.broadcast %216 : vector<16x1xf32> to vector<16x16xf32>
    %230 = arith.cmpf ogt, %228, %229 : vector<16x16xf32>
    %231 = vector.broadcast %225 : vector<1x16xf32> to vector<16x16xf32>
    %232 = vector.broadcast %216 : vector<16x1xf32> to vector<16x16xf32>
    %233 = arith.cmpf oeq, %231, %232 : vector<16x16xf32>
    %234 = arith.cmpi slt, %227, %226 : vector<16x16xi32>
    %235 = arith.andi %233, %234 : vector<16x16xi1>
    %236 = arith.ori %230, %235 : vector<16x16xi1>
    %237 = arith.extui %236 : vector<16x16xi1> to vector<16x16xi32>
    %238 = arith.sitofp %237 : vector<16x16xi32> to vector<16x16xf32>
    %cst_67 = arith.constant dense<0.000000e+00> : vector<16xf32>
    %239 = vector.multi_reduction <add>, %238, %cst_67 [1] : vector<16x16xf32> to vector<16xf32>
    %240 = vector.shape_cast %239 : vector<16xf32> to vector<16x1xf32>
    %cst_68 = arith.constant 2.000000e+00 : f32
    %241 = vector.broadcast %cst_68 : f32 to vector<16x1xf32>
    %242 = arith.cmpf olt, %240, %241 : vector<16x1xf32>
    %243 = arith.extui %242 : vector<16x1xi1> to vector<16x1xi32>
    %244 = arith.sitofp %243 : vector<16x1xi32> to vector<16x1xf32>
    %245 = math.tanh %212 : vector<16x1xf32>
    %246 = arith.mulf %245, %244 : vector<16x1xf32>
    %247 = vector.broadcast %246 : vector<16x1xf32> to vector<16x32xf32>
    %248 = arith.mulf %203, %247 : vector<16x32xf32>
    %cst_69 = arith.constant dense<0.000000e+00> : vector<32xf32>
    %249 = vector.multi_reduction <add>, %248, %cst_69 [0] : vector<16x32xf32> to vector<32xf32>
    %250 = vector.shape_cast %249 : vector<32xf32> to vector<1x32xf32>
    %cst_70 = arith.constant 5.000000e-01 : f32
    %251 = vector.broadcast %cst_70 : f32 to vector<1x32xf32>
    %252 = arith.mulf %250, %251 : vector<1x32xf32>
    %253 = arith.addf %168, %252 : vector<1x32xf32>
    %cst_71 = arith.constant 0.000000e+00 : f32
    %254 = vector.broadcast %cst_71 : f32 to vector<16x1xf32>
    %255 = arith.cmpf ogt, %244, %254 : vector<16x1xf32>
    %cst_72 = arith.constant -1.000000e+30 : f32
    %256 = vector.shape_cast %255 : vector<16x1xi1> to vector<16x1xi1>
    %257 = vector.broadcast %256 : vector<16x1xi1> to vector<16x32xi1>
    %258 = vector.broadcast %cst_72 : f32 to vector<16x32xf32>
    %259 = arith.select %257, %248, %258 : vector<16x32xi1>, vector<16x32xf32>
    %cst_73 = arith.constant dense<0xFF800000> : vector<32xf32>
    %260 = vector.multi_reduction <maximumf>, %259, %cst_73 [0] : vector<16x32xf32> to vector<32xf32>
    %261 = vector.shape_cast %260 : vector<32xf32> to vector<1x32xf32>
    %262 = arith.addf %177, %261 : vector<1x32xf32>
    %263 = arith.truncf %253 : vector<1x32xf32> to vector<1x32xbf16>
    %c0_74 = arith.constant 0 : index
    %c0_75 = arith.constant 0 : index
    %264 = vector.load %arg6[%c0_74, %c0_75] : memref<1088x32xbf16, #tpu.memory_space<vmem>>, vector<32x32xbf16>
    %cst_76 = arith.constant dense<0.000000e+00> : vector<1x32xf32>
    %265 = tpu.matmul %263, %264, %cst_76 {dimension_numbers = #tpu.dot_dimension_numbers<[1], [0], [0], [1], [0, 0, 1, 1], [], []>} : vector<1x32xbf16>, vector<32x32xbf16>, vector<1x32xf32> -> vector<1x32xf32>
    %266 = arith.truncf %262 : vector<1x32xf32> to vector<1x32xbf16>
    %c32 = arith.constant 32 : index
    %c0_77 = arith.constant 0 : index
    %267 = vector.load %arg6[%c32, %c0_77] : memref<1088x32xbf16, #tpu.memory_space<vmem>>, vector<32x32xbf16>
    %cst_78 = arith.constant dense<0.000000e+00> : vector<1x32xf32>
    %268 = tpu.matmul %266, %267, %cst_78 {dimension_numbers = #tpu.dot_dimension_numbers<[1], [0], [0], [1], [0, 0, 1, 1], [], []>} : vector<1x32xbf16>, vector<32x32xbf16>, vector<1x32xf32> -> vector<1x32xf32>
    %269 = arith.addf %265, %268 : vector<1x32xf32>
    %c0_79 = arith.constant 0 : index
    %c0_80 = arith.constant 0 : index
    %c0_81 = arith.constant 0 : index
    %270 = vector.load %arg3[%c0_79, %c0_80, %c0_81] : memref<1x1x1024xbf16, #tpu.memory_space<vmem>>, vector<1x1x1024xbf16>
    %271 = vector.shape_cast %270 : vector<1x1x1024xbf16> to vector<1x1024xbf16>
    %c64 = arith.constant 64 : index
    %c0_82 = arith.constant 0 : index
    %272 = vector.load %arg6[%c64, %c0_82] : memref<1088x32xbf16, #tpu.memory_space<vmem>>, vector<1024x32xbf16>
    %cst_83 = arith.constant dense<0.000000e+00> : vector<1x32xf32>
    %273 = tpu.matmul %271, %272, %cst_83 {dimension_numbers = #tpu.dot_dimension_numbers<[1], [0], [0], [1], [0, 0, 1, 1], [], []>} : vector<1x1024xbf16>, vector<1024x32xbf16>, vector<1x32xf32> -> vector<1x32xf32>
    %274 = arith.addf %269, %273 : vector<1x32xf32>
    %c0_84 = arith.constant 0 : index
    %c0_85 = arith.constant 0 : index
    %275 = vector.load %arg9[%c0_84, %c0_85] : memref<3x128xf32, #tpu.memory_space<vmem>>, vector<1x32xf32>
    %276 = arith.addf %274, %275 : vector<1x32xf32>
    %cst_86 = arith.constant 0.000000e+00 : f32
    %277 = vector.broadcast %cst_86 : f32 to vector<1x32xf32>
    %278 = arith.maximumf %276, %277 : vector<1x32xf32>
    %279 = arith.truncf %278 : vector<1x32xf32> to vector<1x32xbf16>
    %c0_87 = arith.constant 0 : index
    %c0_88 = arith.constant 0 : index
    %280 = vector.load %arg7[%c0_87, %c0_88] : memref<32x16xbf16, #tpu.memory_space<vmem>>, vector<32x16xbf16>
    %cst_89 = arith.constant dense<0.000000e+00> : vector<1x16xf32>
    %281 = tpu.matmul %279, %280, %cst_89 {dimension_numbers = #tpu.dot_dimension_numbers<[1], [0], [0], [1], [0, 0, 1, 1], [], []>} : vector<1x32xbf16>, vector<32x16xbf16>, vector<1x16xf32> -> vector<1x16xf32>
    %c1_90 = arith.constant 1 : index
    %c0_91 = arith.constant 0 : index
    %282 = vector.load %arg9[%c1_90, %c0_91] : memref<3x128xf32, #tpu.memory_space<vmem>>, vector<1x16xf32>
    %283 = arith.addf %281, %282 : vector<1x16xf32>
    %cst_92 = arith.constant 0.000000e+00 : f32
    %284 = vector.broadcast %cst_92 : f32 to vector<1x16xf32>
    %285 = arith.maximumf %283, %284 : vector<1x16xf32>
    %286 = arith.truncf %285 : vector<1x16xf32> to vector<1x16xbf16>
    %c0_93 = arith.constant 0 : index
    %c0_94 = arith.constant 0 : index
    %287 = vector.load %arg8[%c0_93, %c0_94] : memref<16x128xbf16, #tpu.memory_space<vmem>>, vector<16x128xbf16>
    %cst_95 = arith.constant dense<0.000000e+00> : vector<1x128xf32>
    %288 = tpu.matmul %286, %287, %cst_95 {dimension_numbers = #tpu.dot_dimension_numbers<[1], [0], [0], [1], [0, 0, 1, 1], [], []>} : vector<1x16xbf16>, vector<16x128xbf16>, vector<1x128xf32> -> vector<1x128xf32>
    %c2_96 = arith.constant 2 : index
    %c0_97 = arith.constant 0 : index
    %289 = vector.load %arg9[%c2_96, %c0_97] : memref<3x128xf32, #tpu.memory_space<vmem>>, vector<1x128xf32>
    %290 = arith.addf %288, %289 : vector<1x128xf32>
    %c0_98 = arith.constant 0 : index
    %c0_99 = arith.constant 0 : index
    %c0_100 = arith.constant 0 : index
    %291 = vector.load %arg10[%c0_98, %c0_99, %c0_100] : memref<1x1x128xf32, #tpu.memory_space<vmem>>, vector<1x1x128xf32>
    %292 = vector.shape_cast %291 : vector<1x1x128xf32> to vector<1x128xf32>
    %293 = vector.shape_cast %290 : vector<1x128xf32> to vector<1x1x128xf32>
    tpu.vector_store %arg10[%c0_98, %c0_99, %c0_100], %293 {strides = array<i32>} : memref<1x1x128xf32, #tpu.memory_space<vmem>>, vector<1x1x128xf32>,
    return
  }
  func.func @transform_0(%arg0: i32) -> (i32, i32, i32) {
    %c0_i32 = arith.constant 0 : i32
    %c0_i32_0 = arith.constant 0 : i32
    %c0_i32_1 = arith.constant 0 : i32
    return %arg0, %c0_i32, %c0_i32_0 : i32, i32, i32
  }
  func.func @transform_1(%arg0: i32) -> (i32, i32, i32) {
    %c0_i32 = arith.constant 0 : i32
    %c0_i32_0 = arith.constant 0 : i32
    %c0_i32_1 = arith.constant 0 : i32
    return %arg0, %c0_i32, %c0_i32_0 : i32, i32, i32
  }
  func.func @transform_2(%arg0: i32) -> (i32, i32, i32) {
    %c0_i32 = arith.constant 0 : i32
    %c0_i32_0 = arith.constant 0 : i32
    %c0_i32_1 = arith.constant 0 : i32
    return %arg0, %c0_i32, %c0_i32_0 : i32, i32, i32
  }
  func.func @transform_3(%arg0: i32) -> (i32, i32, i32) {
    %c0_i32 = arith.constant 0 : i32
    %c0_i32_0 = arith.constant 0 : i32
    %c0_i32_1 = arith.constant 0 : i32
    %c0_i32_2 = arith.constant 0 : i32
    return %c0_i32, %c0_i32_0, %c0_i32_1 : i32, i32, i32
  }
  func.func @transform_4(%arg0: i32) -> (i32, i32, i32) {
    %c0_i32 = arith.constant 0 : i32
    %c0_i32_0 = arith.constant 0 : i32
    %c0_i32_1 = arith.constant 0 : i32
    %c0_i32_2 = arith.constant 0 : i32
    return %c0_i32, %c0_i32_0, %c0_i32_1 : i32, i32, i32
  }
  func.func @transform_5(%arg0: i32) -> (i32, i32) {
    %c0_i32 = arith.constant 0 : i32
    %c0_i32_0 = arith.constant 0 : i32
    %c0_i32_1 = arith.constant 0 : i32
    return %c0_i32, %c0_i32_0 : i32, i32
  }
  func.func @transform_6(%arg0: i32) -> (i32, i32) {
    %c0_i32 = arith.constant 0 : i32
    %c0_i32_0 = arith.constant 0 : i32
    %c0_i32_1 = arith.constant 0 : i32
    return %c0_i32, %c0_i32_0 : i32, i32
  }
  func.func @transform_7(%arg0: i32) -> (i32, i32) {
    %c0_i32 = arith.constant 0 : i32
    %c0_i32_0 = arith.constant 0 : i32
    %c0_i32_1 = arith.constant 0 : i32
    return %c0_i32, %c0_i32_0 : i32, i32
  }
  func.func @transform_8(%arg0: i32) -> (i32, i32) {
    %c0_i32 = arith.constant 0 : i32
    %c0_i32_0 = arith.constant 0 : i32
    %c0_i32_1 = arith.constant 0 : i32
    return %c0_i32, %c0_i32_0 : i32, i32
  }
  func.func @transform_9(%arg0: i32) -> (i32, i32, i32) {
    %c0_i32 = arith.constant 0 : i32
    %c0_i32_0 = arith.constant 0 : i32
    %c0_i32_1 = arith.constant 0 : i32
    return %arg0, %c0_i32, %c0_i32_0 : i32, i32, i32
  }
}

</mosaic_0001>

<bundles_post_ra>
// kernel: sag_network_forward.1
= control target key start
LH: loop header
LB: loop body
LE: loop exit
PB: predicated region body
PF: predicated region fallthrough
CT: control target
= control target key end

     0   :  { %14 = vsyncpa [#allocation3], 0  ;;  %s4002_s0 = inlined_call_operand.vmem [shape: f32[4,16,16], index: 0, kind: input, shape index: {}]   ;;  %s4003_s1 = inlined_call_operand.vmem [shape: f32[4,16,32], index: 1, kind: input, shape index: {}]   ;;  %s4004_s2 = inlined_call_operand.vmem [shape: bf16[4,1,1024], index: 2, kind: input, shape index: {}]   ;;  %s4005_s3 = inlined_call_operand.vmem [shape: bf16[3,32,32], index: 3, kind: input, shape index: {}]   ;;  %s4006_s4 = inlined_call_operand.vmem [shape: f32[3,3,32], index: 4, kind: input, shape index: {}]   ;;  %s4007_s5 = inlined_call_operand.vmem [shape: bf16[1088,32], index: 5, kind: input, shape index: {}]   ;;  %s4008_s6 = inlined_call_operand.vmem [shape: bf16[32,16], index: 6, kind: input, shape index: {}]   ;;  %s4009_s7 = inlined_call_operand.vmem [shape: bf16[16,128], index: 7, kind: input, shape index: {}]   ;;  %s4010_s8 = inlined_call_operand.vmem [shape: f32[3,128], index: 8, kind: input, shape index: {}]   ;;  %s4011_s9 = inlined_call_operand.hbm [shape: f32[4,1,128], index: 9, kind: output, shape index: {}]  }
   0x1   :  { %16 = vsyncpa [#allocation3 + $0x1], 0  ;;  %s3339_s30 = smov 0   ;;  %s3341_s10 = smov 0  }
   0x2   :  { %s3343_s11 = smov 0   ;;  %s3345_s12 = smov 0  }
   0x3 LB: > { %s3360_s13 = sadd.s32 4294967295, %s3281_s12   ;;  %s2655_s14 = sadd.s32 4294967294, %s3281_s12   ;;  %s3281_s12 = sphi %s3345_s12, %s4017_s12   ;;  %s3277_s11 = sphi %s3343_s11, %s4016_s11   ;;  %s3273_s10 = sphi %s3341_s10, %s4015_s10   ;;  %s3269_s30 = sphi %s3339_s30, %s4014_s30  }
   0x4   : > { %s3364_s15 = sadd.s32 1, %s3281_s12   ;;  %s233_s16 = sadd.s32 1, %s3277_s11 }
   0x5   : > { %s230_s17 = ssub.s32 %s3281_s12, %s3364_s15  ;;  %p243_p0 = scmp.ne.s32.totalorder %s3277_s11, %s3273_s10 }
   0x6   : > { %p231_p1 = scmp.eq.s32.totalorder %s230_s17, 0  ;;  %p244_p2 = scmp.eq.s32.totalorder %s3360_s13, 3 }
   0x7   : > { %p249_p3 = scmp.ne.s32.totalorder %s3273_s10, %s3269_s30  ;;  %p250_p4 = scmp.eq.s32.totalorder %s2655_s14, 3 }
   0x8   : > { %s3375_s18 = scalar_select %p231_p1, %s3277_s11, %s233_s16  }
   0x9   : > { %p3377_p5 = por %p244_p2, %p243_p0  ;;  %p3381_p6 = por %p250_p4, %p249_p3 }
   0xa   : > { %p2658_p7 = scmp.ge.s32.totalorder %s3281_s12, 1  ;;  %p309_p8 = scmp.lt.s32.totalorder %s3281_s12, 5 }
   0xc   : > { %p310_p9 = pnand %p2658_p7, %p309_p8 }
   0xd   : > { %p353_p10 = scmp.lt.s32.totalorder (!%p310_p9), %s3360_s13, 3  ;;  %v3283_v0 = vmov (!%p310_p9), 1.0|1.0   ;;  %v3284_v1 = vmov (!%p310_p9), 0.0   ;;  %vm378_vm0 = vcmask (!%p310_p9), 130048   ;;  %vm3285_vm1 = vmmov (!%p310_p9), 0  }
   0xe   : > { %313 = sbr.rel (%p310_p9) target bundleno = 4689 (0x1251), region = 56  ;;  %3048 = vmatprep.subr.bf16.mxu1 (!%p310_p9), %v3283_v0  ;;  %2949 = vmatprep.subr.bf16.mxu0 (!%p310_p9), %v3284_v1  ;;  %v3116_v2 = vld [vmem:[%s4005_s3] sm:$0xff] (!%p310_p9)   ;;  %v3117_v5 = vld [vmem:[%s4005_s3 + $0x8] sm:$0xff] (!%p310_p9)   ;;  %vm477_vm2 = vcmask (!%p310_p9), 261120   ;;  %v3286_v9 = vmov (!%p310_p9), 0   ;;  %v581_v26 = vlaneseq (!%p310_p9)  ;;  %s351_s17 = sand.u32 (!%p310_p9), 1, %s3273_s10  }
   0xf   : > { %3049 = vmatpush3.bf16.msra.mxu1 (!%p310_p9), %v3283_v0  ;;  %2951 = vmatprep.mubr.msk.bf16.mxu0 (!%p310_p9), %vm3285_vm1, %v3284_v1  ;;  %v377_v29 = vld [vmem:[%s4006_s4] sm:$0x7] (!%p310_p9)  ;;  %s2791_s24 = sshll.u32 (!%p310_p9), %s3360_s13, 4  ;;  %s352_s25 = scalar_lea.vmem (!%p310_p9), [#allocation2], %s351_s17 }
  0x10   : > { %2941 = vmatprep.subr.bf16.mxu1 (!%p310_p9), %v3284_v1  ;;  %3114 = vset.pattern.permute.xlu0 (!%p310_p9), %v3286_v9  ;;  %v3436_v27 = vshrl.u32 (!%p310_p9), %v581_v26, 7  ;;  %v3473_v61 = vand.u32 (!%p310_p9), 127, %v581_v26  ;;  %s3960_s29 = scalar_lea.hbm (!%p310_p9), %s4011_s9, %s2791_s24 }
  0x11   : > { %3115 = vset.pattern.permute.xlu1 (!%p310_p9), %v3286_v9 }
  0x12   : > { %v3439_v28 = vsub.s32 (!%p310_p9), 0, %v3436_v27  ;;  %v3446_v31 = vsub.s32 (!%p310_p9), 1, %v3436_v27  ;;  %v3467_v52 = vsub.s32 (!%p310_p9), 2, %v3436_v27  ;;  %v3471_v60 = vadd.s32 (!%p310_p9), 8, %v3436_v27 }
  0x13   : > { %vm694_vm4 = vcmp.eq.s32.totalorder (!%p310_p9), %v3436_v27, %v3473_v61  ;;  %vm725_vm9 = vcmp.lt.s32.totalorder (!%p310_p9), %v3473_v61, %v3436_v27 }
  0x14   : > { %v584_v30 = vrot.slane (!%p310_p9), %v377_v29, %v3439_v28  ;;  %v592_v39 = vrot.slane (!%p310_p9), %v377_v29, %v3446_v31  ;;  %v683_v53 = vrot.slane (!%p310_p9), %v377_v29, %v3467_v52  ;;  %vm695_vm3 = vcmp.eq.s32.totalorder (!%p310_p9), %v3471_v60, %v3473_v61 }
  0x15   : > { %s3392_s21 = scalar_select %p353_p10, %s3360_s13, 3  ;;  %v3480_v62 = vsel %vm695_vm3, 1.0, %v3284_v1  ;;  %v3483_v63 = vsel %vm694_vm4, 1.0, %v3284_v1  ;;  %vm726_vm5 = vcmp.lt.s32.totalorder %v3473_v61, %v3471_v60 }
  0x17   : > { %s2794_s22 = sshll.u32 %s3392_s21, 4  ;;  %s2663_s26 = sshll.u32 %s3392_s21, 3 }
  0x18   : > { %s3404_s27 = scalar_lea.vmem %s4002_s0, %s2794_s22  ;;  %s362_s14 = scalar_lea.vmem %s4003_s1, %s2794_s22 }
  0x19   : > { %v3410_v3 = vld [vmem:[%s3404_s27] sm:$0xff]  ;;  %v3413_v4 = vld [vmem:[%s3404_s27 + $0x8] sm:$0xff]  ;;  %s3288_s21 = smov [#allocation2]  }
  0x1a   : > { %2938 = vmatprep.mubr.msk.f32.mxu1 %vm378_vm0, %v3410_v3  ;;  %v371_v6 = vld [vmem:[%s362_s14] sm:$0xff]  ;;  %v372_v7 = vld [vmem:[%s362_s14 + $0x8] sm:$0xff]  ;;  %v3430_v25 = vpack.c.bf16 %v3413_v4, %v3410_v3  ;;  %s366_s14 = scalar_lea.vmem %s4004_s2, %s2663_s26  ;;  %s3223_s16 = sshll.u32 %s3288_s21, 4  ;;  %s3224_s16 = int_to_ptr.vmem [resolvable:$false] %s3223_s16 }
  0x1b   : > { %2939 = vmatmul.mubr.msk.f32.vlgmr.msra.gmra.mrb[0].mxu1 %vm378_vm0, %v3413_v4  ;;  %v464_v8 = vpack.c.bf16 %v372_v7, %v371_v6  ;;  %s3225_s22 = scalar_lea.vmem %s3224_s16, 32 }
  0x1c   : > { %2942 = vmatpush3.bf16.msra.mxu1 %v3116_v2  ;;  %2945 = vmatprep.mubr.msk.bf16.mxu1 %vm3285_vm1, %v3284_v1 }
  0x1d   : > { %2943 = vmatprep.subr.bf16.mxu1 %v3284_v1 }
  0x20   : > { %2944 = vmatpush3.bf16.msra.mxu1 %v3117_v5 }
  0x23   : > { %2946 = vmatmul.mubr.msk.bf16.vlgmr.msra.gmra.mrb[4].mxu1 %vm477_vm2, %v464_v8 }
  0x24   : > { %2966 = vmatprep.mubr.msk.f32.mxu1 %vm378_vm0, %v3410_v3 }
  0xee   : > { %v2940_v10 = vpop.f32.mrb[0].mxu1 }
  0xef   : > { %v451_v11 = vpop.f32.mrb[1].mxu1  ;;  %v461_v13 = vmax.f32 %v2940_v10, 1.0 }
  0xf0   : > { %v460_v12 = vmax.f32 %v451_v11, 1.0 }
  0xf2   : > { %3194 = vrsqrt.f32 %v460_v12 }
  0xf3   : > { %3196 = vrsqrt.f32 %v461_v13 }
  0xf6   : > { %v515_v14 = vpop.f32.mrb[4].mxu1 }
  0xf7   : > { %v2947_v15 = vpop.f32.mrb[5].mxu1 }
  0xf8   : > { %v518_v17 = vpop.f32.mrb[6].mxu1 }
  0xf9   : > { %v2948_v18 = vpop.f32.mrb[7].mxu1 }
  0xfc   : > { %v3195_v16 = vpop.eup %3194 }
  0xfd   : > { %524 = vperm.xlu0 %3114, %v3195_v16   ;;  %v3197_v19 = vpop.eup %3196 }
 0x101   : > { %529 = vperm.xlu0 %3114, %v3197_v19  }
 0x17c   : > { %v525_v20 = vpop.permute.xlu0 %524 }
 0x17d   : > { %v532_v22 = vmul.f32 %v525_v20, %v515_v14 }
 0x180   : > { %v530_v21 = vpop.permute.xlu0 %529 }
 0x181   : > { %v533_v23 = vmul.f32 %v530_v21, %v518_v17 }
 0x183   : > { %v534_v24 = vpack.c.bf16 %v533_v23, %v532_v22 }
 0x185   : > { %2950 = vmatpush3.bf16.msra.mxu0 %v534_v24 }
 0x188   : > { %2952 = vmatmul.mubr.msk.bf16.vlgmr.msra.gmra.mrb[0].mxu0 %vm378_vm0, %v3430_v25 }
 0x189   : > { %2959 = vmatprep.mubr.msk.f32.mxu0 %vm378_vm0, %v3410_v3 }
 0x25b   : > { %v572_v32 = vpop.f32.mrb[0].mxu0 }
 0x25c   : > { %v579_v33 = vmul.f32 %v572_v32, %v525_v20  ;;  %v2953_v34 = vpop.f32.mrb[1].mxu0 }
 0x25d   : > { %v575_v35 = vpop.f32.mrb[2].mxu0  ;;  %v3119_v34 = vld [vmem:[%s4005_s3 + $0x18] sm:$0xff]  }
 0x25e   : > { %v3448_v36 = vadd.f32 %v584_v30, %v579_v33  ;;  %v580_v37 = vmul.f32 %v575_v35, %v530_v21  ;;  %v2954_v38 = vpop.f32.mrb[3].mxu0  ;;  %v3118_v21 = vld [vmem:[%s4005_s3 + $0x10] sm:$0xff]  }
 0x260   : > { %v587_v40 = vmax.f32 %v3448_v36, 0.0  ;;  %v3452_v41 = vadd.f32 %v584_v30, %v580_v37 }
 0x262   : > { %v588_v42 = vmax.f32 %v3452_v41, 0.0  ;;  %v593_v43 = vmul.f32 %v592_v39, %v587_v40 }
 0x264   : > { %v595_v44 = vsel %vm477_vm2, %v593_v43, 0.0  ;;  %v594_v45 = vmul.f32 %v592_v39, %v588_v42 }
 0x265   : > { %596 = vadd.xlane.f32.xlu1 %v595_v44 }
 0x266   : > { %v598_v46 = vsel %vm477_vm2, %v594_v45, 0.0 }
 0x269   : > { %599 = vadd.xlane.f32.xlu1 %v598_v46 }
 0x2f2   : > { %v597_v47 = vpop.xlane.xlu1 %596 }
 0x2f3   : > { %v601_v49 = vmul.f32 %v3195_v16, %v597_v47 }
 0x2f6   : > { %v600_v48 = vpop.xlane.xlu1 %599 }
 0x2f7   : > { %v602_v50 = vmul.f32 %v3197_v19, %v600_v48 }
 0x2f9   : > { %v3050_v51 = vpack.c.bf16 %v602_v50, %v601_v49 }
 0x2fb   : > { %3051 = vmatprep.subr.bf16.mxu0 %v3050_v51 }
 0x2fc   : > { %3053 = vmatpush3.bf16.msra.mxu0 %v3050_v51 }
 0x2fd   : > { %2969 = vmatprep.subr.bf16.mxu0 %v3284_v1 }
 0x2ff   : > { %2960 = vmatmul.mubr.msk.f32.vlgmr.msra.gmra.mrb[4].mxu0 %vm378_vm0, %v3413_v4 }
 0x300   : > { %2973 = vmatprep.mubr.msk.bf16.mxu0 %vm3285_vm1, %v3284_v1  ;;  %2970 = vmatpush3.bf16.msra.mxu0 %v3118_v21 }
 0x301   : > { %2971 = vmatprep.subr.bf16.mxu0 %v3284_v1 }
 0x304   : > { %2972 = vmatpush3.bf16.msra.mxu0 %v3119_v34 }
 0x3d2   : > { %v2961_v54 = vpop.f32.mrb[4].mxu0 }
 0x3d3   : > { %v679_v55 = vmul.f32 %v3197_v19, %v2961_v54  ;;  %v669_v56 = vpop.f32.mrb[5].mxu0 }
 0x3d4   : > { %v678_v57 = vmul.f32 %v3195_v16, %v669_v56 }
 0x3d5   : > { %v685_v58 = vadd.f32 %v683_v53, %v679_v55 }
 0x3d6   : > { %v684_v59 = vadd.f32 %v683_v53, %v678_v57 }
 0x3d7   : > { %707 = vperm.xlu1 %3115, %v685_v58   ;;  %3198 = vtanh.f32 %v685_v58 }
 0x3d8   : > { %702 = vperm.xlu0 %3114, %v684_v59   ;;  %3200 = vtanh.f32 %v684_v59 }
 0x3e1   : > { %v3199_v23 = vpop.eup %3198 }
 0x3e2   : > { %v3201_v30 = vpop.eup %3200 }
 0x456   : > { %v708_v2 = vpop.permute.xlu1 %707 }
 0x457   : > { %v711_v5 = vmul.f32 %v3480_v62, %v708_v2  ;;  %v703_v6 = vpop.permute.xlu0 %702 }
 0x458   : > { %v710_v7 = vmul.f32 %v3483_v63, %v703_v6 }
 0x459   : > { %v713_v8 = vsel %vm378_vm0, %v711_v5, 0.0 }
 0x45a   : > { %v712_v9 = vsel %vm378_vm0, %v710_v7, 0.0 }
 0x45b   : > { %v714_v10 = vadd.f32 %v713_v8, %v712_v9 }
 0x45d   : > { %v715_v11 = vrot.slane %v714_v10, 4 }
 0x45f   : > { %v716_v12 = vadd.f32 %v715_v11, %v714_v10  ;;  %v2682_v10 = vld [vmem:[%s4006_s4 + $0x4] sm:$0x7] }
 0x460   : > { %v996_v11 = vrot.slane %v2682_v10, %v3439_v28  ;;  %v1006_v21 = vrot.slane %v2682_v10, %v3446_v31 }
 0x461   : > { %v717_v13 = vrot.slane %v716_v12, 2 }
 0x463   : > { %v718_v14 = vadd.f32 %v717_v13, %v716_v12 }
 0x465   : > { %v719_v15 = vrot.slane %v718_v14, 1 }
 0x467   : > { %v720_v16 = vadd.f32 %v719_v15, %v718_v14 }
 0x469   : > { %vm723_vm6 = vcmp.eq.f32.partialorder %v720_v16, %v703_v6  ;;  %vm722_vm7 = vcmp.gt.f32.partialorder %v720_v16, %v708_v2  ;;  %vm724_vm8 = vcmp.eq.f32.partialorder %v720_v16, %v708_v2  ;;  %vm721_vm11 = vcmp.gt.f32.partialorder %v720_v16, %v703_v6 }
 0x46a   : > { %vm728_vm10 = vmand %vm724_vm8, %vm726_vm5 }
 0x46b   : > { %vm730_vm12 = vmor %vm722_vm7, %vm728_vm10 }
 0x46c   : > { %v2675_v17 = vsel %vm730_vm12, 1.0, %v3284_v1  ;;  %vm727_vm13 = vmand %vm723_vm6, %vm725_vm9 }
 0x46d   : > { %v738_v18 = vsel %vm378_vm0, %v2675_v17, 0.0  ;;  %vm729_vm14 = vmor %vm721_vm11, %vm727_vm13 }
 0x46e   : > { %739 = vadd.xlane.f32.xlu1 %v738_v18  ;;  %v2674_v19 = vsel %vm729_vm14, 1.0, %v3284_v1 }
 0x46f   : > { %v735_v20 = vsel %vm378_vm0, %v2674_v19, 0.0 }
 0x470   : > { %736 = vadd.xlane.f32.xlu0 %v735_v20 }
 0x4fb   : > { %v740_v22 = vpop.xlane.xlu1 %739 }
 0x4fc   : > { %vm742_vm15 = vcmp.lt.f32.partialorder %v740_v22, 8.0 }
 0x4fd   : > { %v3508_v24 = vsel %vm742_vm15, 1.0, %v3284_v1  ;;  %v737_v26 = vpop.xlane.xlu0 %736 }
 0x4fe   : > { %vm741_vm3 = vcmp.lt.f32.partialorder %v737_v26, 8.0  ;;  %v750_v29 = vmul.f32 %v3199_v23, %v3508_v24  ;;  %vm775_vm6 = vcmp.gt.f32.partialorder %v3508_v24, 0.0 }
 0x4ff   : > { %v3512_v32 = vsel %vm741_vm3, 1.0, %v3284_v1  ;;  %vm3054_vm4 = vmpackc.low %vm742_vm15, %vm741_vm3 }
 0x500   : > { %3055 = vmatprep.subr.msk.bf16.mxu1 %vm3054_vm4, %v3283_v0  ;;  %758 = vperm.xlu1 %3115, %v750_v29   ;;  %v749_v33 = vmul.f32 %v3201_v30, %v3512_v32  ;;  %vm774_vm7 = vcmp.gt.f32.partialorder %v3512_v32, 0.0 }
 0x501   : > { %3057 = vmatpush3.bf16.msk.msra.mxu1 %vm3054_vm4, %v3283_v0 }
 0x502   : > { %753 = vperm.xlu0 %3114, %v749_v33   ;;  %2977 = vmatprep.subr.bf16.mxu1 %v3284_v1 }
 0x504   : > { %2967 = vmatmul.mubr.msk.f32.vlgmr.msra.gmra.mrb[2].mxu1 %vm378_vm0, %v3413_v4 }
 0x505   : > { %2979 = vmatprep.mubr.msk.bf16.mxu1 %vm3285_vm1, %v3284_v1 }
 0x57f   : > { %v759_v35 = vpop.permute.xlu1 %758 }
 0x580   : > { %v762_v37 = vmul.f32 %v759_v35, %v588_v42 }
 0x581   : > { %v754_v38 = vpop.permute.xlu0 %753 }
 0x582   : > { %v764_v39 = vsel %vm477_vm2, %v762_v37, 0.0  ;;  %v761_v43 = vmul.f32 %v754_v38, %v587_v40  ;;  %v781_v44 = vsel %vm775_vm6, %v762_v37, -1e+30 }
 0x583   : > { %v783_v45 = vsel %vm477_vm2, %v781_v44, -inf  ;;  %v1097_v44 = vrot.slane %v2682_v10, %v3467_v52 }
 0x584   : > { %v763_v46 = vsel %vm477_vm2, %v761_v43, 0.0  ;;  %v880_v47 = vpack.c.bf16 %v762_v37, %v761_v43  ;;  %v780_v41 = vsel %vm774_vm7, %v761_v43, -1e+30 }
 0x585   : > { %v3538_v42 = vadd.f32 %v764_v39, %v763_v46  ;;  %v782_v48 = vsel %vm477_vm2, %v780_v41, -inf }
 0x586   : > { %2974 = vmatmul.mubr.msk.bf16.vlgmr.msra.gmra.mrb[8].mxu0 %vm477_vm2, %v880_v47  ;;  %v3542_v36 = vmax.f32 %v782_v48, %v783_v45 }
 0x587   : > { %2994 = vmatprep.mubr.msk.f32.mxu0 %vm378_vm0, %v3410_v3 }
 0x5d7   : > { %v2968_v40 = vpop.f32.mrb[2].mxu1 }
 0x5d8   : > { %v865_v49 = vpop.f32.mrb[3].mxu1  ;;  %v875_v50 = vmax.f32 %v2968_v40, 1.0 }
 0x5d9   : > { %v874_v51 = vmax.f32 %v865_v49, 1.0 }
 0x5db   : > { %3202 = vrsqrt.f32 %v874_v51 }
 0x5dc   : > { %3204 = vrsqrt.f32 %v875_v50 }
 0x5e5   : > { %v3203_v53 = vpop.eup %3202 }
 0x5e6   : > { %v878_v54 = vmul.f32 %v3203_v53, %v3512_v32  ;;  %v3205_v55 = vpop.eup %3204 }
 0x5e7   : > { %v879_v56 = vmul.f32 %v3205_v55, %v3508_v24 }
 0x5e8   : > { %939 = vperm.xlu0 %3114, %v878_v54  }
 0x5ec   : > { %944 = vperm.xlu0 %3114, %v879_v56  }
 0x659   : > { %v930_v57 = vpop.f32.mrb[8].mxu0 }
 0x65a   : > { %v2975_v58 = vpop.f32.mrb[9].mxu0 }
 0x65b   : > { %v933_v59 = vpop.f32.mrb[10].mxu0 }
 0x65c   : > { %v2976_v2 = vpop.f32.mrb[11].mxu0 }
 0x667   : > { %v940_v5 = vpop.permute.xlu0 %939 }
 0x668   : > { %v947_v7 = vmul.f32 %v940_v5, %v930_v57 }
 0x66b   : > { %v945_v6 = vpop.permute.xlu0 %944 }
 0x66c   : > { %v948_v8 = vmul.f32 %v945_v6, %v933_v59 }
 0x66e   : > { %v949_v9 = vpack.c.bf16 %v948_v8, %v947_v7 }
 0x670   : > { %2978 = vmatpush3.bf16.msra.mxu1 %v949_v9 }
 0x673   : > { %2980 = vmatmul.mubr.msk.bf16.vlgmr.msra.gmra.mrb[8].mxu1 %vm378_vm0, %v3430_v25 }
 0x674   : > { %2987 = vmatprep.mubr.msk.f32.mxu1 %vm378_vm0, %v3410_v3 }
 0x746   : > { %v984_v12 = vpop.f32.mrb[8].mxu1 }
 0x747   : > { %v991_v13 = vmul.f32 %v984_v12, %v940_v5  ;;  %v2981_v14 = vpop.f32.mrb[9].mxu1 }
 0x748   : > { %v987_v15 = vpop.f32.mrb[10].mxu1 }
 0x749   : > { %v997_v16 = vadd.f32 %v996_v11, %v991_v13  ;;  %v992_v17 = vmul.f32 %v987_v15, %v945_v6  ;;  %v2982_v18 = vpop.f32.mrb[11].mxu1 }
 0x74b   : > { %v999_v19 = vmax.f32 %v997_v16, 0.0  ;;  %v998_v20 = vadd.f32 %v996_v11, %v992_v17  ;;  %v3120_v11 = vld [vmem:[%s4005_s3 + $0x20] sm:$0xff]  }
 0x74d   : > { %v1000_v22 = vmax.f32 %v998_v20, 0.0  ;;  %v3558_v23 = vmul.f32 %v3512_v32, %v999_v19  ;;  %v3121_v20 = vld [vmem:[%s4005_s3 + $0x28] sm:$0xff]  }
 0x74f   : > { %v1007_v26 = vmul.f32 %v1006_v21, %v3558_v23  ;;  %v3562_v29 = vmul.f32 %v3508_v24, %v1000_v22 }
 0x751   : > { %v1009_v30 = vsel %vm477_vm2, %v1007_v26, 0.0  ;;  %v1008_v33 = vmul.f32 %v1006_v21, %v3562_v29  ;;  %v766_v21 = vrot.slane %v3538_v42, 4 }
 0x752   : > { %1010 = vadd.xlane.f32.xlu0 %v1009_v30 }
 0x753   : > { %v1012_v34 = vsel %vm477_vm2, %v1008_v33, 0.0  ;;  %v767_v22 = vadd.f32 %v766_v21, %v3538_v42 }
 0x754   : > { %1013 = vadd.xlane.f32.xlu1 %v1012_v34 }
 0x7df   : > { %v1011_v35 = vpop.xlane.xlu0 %1010 }
 0x7e0   : > { %v1015_v38 = vmul.f32 %v1011_v35, %v878_v54 }
 0x7e1   : > { %v1014_v37 = vpop.xlane.xlu1 %1013 }
 0x7e2   : > { %v1016_v39 = vmul.f32 %v1014_v37, %v879_v56 }
 0x7e4   : > { %v3058_v43 = vpack.c.bf16 %v1016_v39, %v1015_v38  ;;  %v768_v38 = vrot.slane %v767_v22, 2 }
 0x7e6   : > { %3059 = vmatprep.subr.bf16.mxu1 %v3058_v43 }
 0x7e7   : > { %3061 = vmatpush3.bf16.msra.mxu1 %v3058_v43 }
 0x7e8   : > { %2997 = vmatprep.subr.bf16.mxu1 %v3284_v1 }
 0x7ea   : > { %2988 = vmatmul.mubr.msk.f32.vlgmr.msra.gmra.mrb[12].mxu1 %vm378_vm0, %v3413_v4 }
 0x7eb   : > { %3001 = vmatprep.mubr.msk.bf16.mxu1 %vm3285_vm1, %v3284_v1  ;;  %2998 = vmatpush3.bf16.msra.mxu1 %v3120_v11 }
 0x7ec   : > { %2999 = vmatprep.subr.bf16.mxu1 %v3284_v1 }
 0x7ef   : > { %3000 = vmatpush3.bf16.msra.mxu1 %v3121_v20 }
 0x7f0   : > { %3018 = vmatprep.subr.bf16.mxu1 %v3284_v1 }
 0x8bd   : > { %v2989_v45 = vpop.f32.mrb[12].mxu1 }
 0x8be   : > { %v1093_v46 = vmul.f32 %v2989_v45, %v879_v56  ;;  %v1083_v47 = vpop.f32.mrb[13].mxu1 }
 0x8bf   : > { %v1092_v41 = vmul.f32 %v1083_v47, %v878_v54 }
 0x8c0   : > { %v1099_v48 = vadd.f32 %v1097_v44, %v1093_v46  ;;  %v769_v46 = vadd.f32 %v768_v38, %v767_v22 }
 0x8c1   : > { %v1098_v40 = vadd.f32 %v1097_v44, %v1092_v41 }
 0x8c2   : > { %v1101_v49 = vsel %vm775_vm6, %v1099_v48, -1e+30  ;;  %3206 = vtanh.f32 %v1099_v48 }
 0x8c3   : > { %1109 = vperm.xlu1 %3115, %v1101_v49   ;;  %v1100_v50 = vsel %vm774_vm7, %v1098_v40, -1e+30  ;;  %3208 = vtanh.f32 %v1098_v40 }
 0x8c4   : > { %1104 = vperm.xlu0 %3114, %v1100_v50   ;;  %v770_v50 = vrot.slane %v769_v46, 1 }
 0x8cc   : > { %v3207_v13 = vpop.eup %3206 }
 0x8cd   : > { %v3209_v17 = vpop.eup %3208 }
 0x942   : > { %v1110_v51 = vpop.permute.xlu1 %1109 }
 0x943   : > { %v1113_v53 = vmul.f32 %v3480_v62, %v1110_v51  ;;  %v1105_v55 = vpop.permute.xlu0 %1104 }
 0x944   : > { %v1112_v57 = vmul.f32 %v3483_v63, %v1105_v55 }
 0x945   : > { %v1115_v56 = vsel %vm378_vm0, %v1113_v53, 0.0 }
 0x946   : > { %v1114_v54 = vsel %vm378_vm0, %v1112_v57, 0.0 }
 0x947   : > { %v1116_v58 = vadd.f32 %v1115_v56, %v1114_v54  ;;  %v771_v54 = vadd.f32 %v770_v50, %v769_v46 }
 0x949   : > { %v1117_v59 = vrot.slane %v1116_v58, 4 }
 0x94b   : > { %v1118_v2 = vadd.f32 %v1117_v59, %v1116_v58 }
 0x94d   : > { %v1119_v24 = vrot.slane %v1118_v2, 2 }
 0x94f   : > { %v1120_v5 = vadd.f32 %v1119_v24, %v1118_v2 }
 0x951   : > { %v1121_v6 = vrot.slane %v1120_v5, 1 }
 0x953   : > { %v1122_v7 = vadd.f32 %v1121_v6, %v1120_v5  ;;  %v772_v6 = vmul.f32 0.125, %v771_v54 }
 0x955   : > { %vm1125_vm8 = vcmp.eq.f32.partialorder %v1122_v7, %v1105_v55  ;;  %vm1124_vm10 = vcmp.gt.f32.partialorder %v1122_v7, %v1110_v51  ;;  %vm1126_vm11 = vcmp.eq.f32.partialorder %v1122_v7, %v1110_v51  ;;  %vm1123_vm13 = vcmp.gt.f32.partialorder %v1122_v7, %v1105_v55 }
 0x956   : > { %vm1128_vm12 = vmand %vm1126_vm11, %vm726_vm5 }
 0x957   : > { %vm1130_vm14 = vmor %vm1124_vm10, %vm1128_vm12 }
 0x958   : > { %v2694_v32 = vsel %vm1130_vm14, 1.0, %v3284_v1  ;;  %vm1127_vm15 = vmand %vm1125_vm8, %vm725_vm9 }
 0x959   : > { %v1138_v8 = vsel %vm378_vm0, %v2694_v32, 0.0  ;;  %vm1129_vm3 = vmor %vm1123_vm13, %vm1127_vm15 }
 0x95a   : > { %1139 = vadd.xlane.f32.xlu1 %v1138_v8  ;;  %v2693_v9 = vsel %vm1129_vm3, 1.0, %v3284_v1 }
 0x95b   : > { %v1135_v10 = vsel %vm378_vm0, %v2693_v9, 0.0 }
 0x95c   : > { %1136 = vadd.xlane.f32.xlu0 %v1135_v10 }
 0x9e7   : > { %v1140_v12 = vpop.xlane.xlu1 %1139 }
 0x9e8   : > { %vm1142_vm4 = vcmp.lt.f32.partialorder %v1140_v12, 4.0 }
 0x9e9   : > { %v3596_v14 = vsel %vm1142_vm4, 1.0, %v3284_v1  ;;  %v1137_v15 = vpop.xlane.xlu0 %1136 }
 0x9ea   : > { %vm1141_vm6 = vcmp.lt.f32.partialorder %v1137_v15, 4.0  ;;  %v1150_v16 = vmul.f32 %v3207_v13, %v3596_v14  ;;  %vm1175_vm8 = vcmp.gt.f32.partialorder %v3596_v14, 0.0 }
 0x9eb   : > { %v3600_v18 = vsel %vm1141_vm6, 1.0, %v3284_v1  ;;  %vm3062_vm7 = vmpackc.low %vm1142_vm4, %vm1141_vm6 }
 0x9ec   : > { %3063 = vmatprep.subr.msk.bf16.mxu0 %vm3062_vm7, %v3283_v0  ;;  %1158 = vperm.xlu1 %3115, %v1150_v16   ;;  %v1149_v19 = vmul.f32 %v3209_v17, %v3600_v18  ;;  %vm1174_vm10 = vcmp.gt.f32.partialorder %v3600_v18, 0.0 }
 0x9ed   : > { %3065 = vmatpush3.bf16.msk.msra.mxu0 %vm3062_vm7, %v3283_v0  ;;  %v785_v0 = vrot.slane %v3542_v36, 4 }
 0x9ee   : > { %1153 = vperm.xlu0 %3114, %v1149_v19   ;;  %3005 = vmatprep.subr.bf16.mxu0 %v3284_v1 }
 0x9ef   : > { %v786_v34 = vmax.f32 %v3542_v36, %v785_v0 }
 0x9f0   : > { %2995 = vmatmul.mubr.msk.f32.vlgmr.msra.gmra.mrb[6].mxu0 %vm378_vm0, %v3413_v4 }
 0x9f1   : > { %3007 = vmatprep.mubr.msk.bf16.mxu0 %vm3285_vm1, %v3284_v1  ;;  %v787_v45 = vrot.slane %v786_v34, 2 }
 0x9f3   : > { %v788_v40 = vmax.f32 %v786_v34, %v787_v45 }
 0x9f5   : > { %v789_v57 = vrot.slane %v788_v40, 1 }
 0x9f7   : > { %v790_v24 = vmax.f32 %v788_v40, %v789_v57 }
 0xa6b   : > { %v1159_v26 = vpop.permute.xlu1 %1158 }
 0xa6c   : > { %v1162_v30 = vmul.f32 %v1159_v26, %v3562_v29 }
 0xa6d   : > { %v1154_v33 = vpop.permute.xlu0 %1153 }
 0xa6e   : > { %v1164_v4 = vsel %vm477_vm2, %v1162_v30, 0.0  ;;  %v1161_v35 = vmul.f32 %v1154_v33, %v3558_v23  ;;  %v1181_v37 = vsel %vm1175_vm8, %v1162_v30, -1e+30 }
 0xa6f   : > { %v1183_v39 = vsel %vm477_vm2, %v1181_v37, -inf }
 0xa70   : > { %v1163_v42 = vsel %vm477_vm2, %v1161_v35, 0.0  ;;  %v1280_v29 = vpack.c.bf16 %v1162_v30, %v1161_v35  ;;  %v1180_v43 = vsel %vm1174_vm10, %v1161_v35, -1e+30 }
 0xa71   : > { %v1165_v44 = vadd.f32 %v1164_v4, %v1163_v42  ;;  %v1182_v36 = vsel %vm477_vm2, %v1180_v43, -inf  ;;  %v2701_v4 = vld [vmem:[%s4006_s4 + $0x8] sm:$0x7] }
 0xa72   : > { %3002 = vmatmul.mubr.msk.bf16.vlgmr.msra.gmra.mrb[16].mxu1 %vm477_vm2, %v1280_v29  ;;  %v1184_v23 = vmax.f32 %v1182_v36, %v1183_v39  ;;  %v1396_v35 = vrot.slane %v2701_v4, %v3439_v28 }
 0xa73   : > { %v1166_v47 = vrot.slane %v1165_v44, 4  ;;  %3022 = vmatprep.mubr.msk.bf16.mxu1 %vm3285_vm1, %v3284_v1 }
 0xa74   : > { %v1185_v41 = vrot.slane %v1184_v23, 4 }
 0xa75   : > { %v1167_v48 = vadd.f32 %v1166_v47, %v1165_v44 }
 0xa76   : > { %v1186_v49 = vmax.f32 %v1184_v23, %v1185_v41 }
 0xa77   : > { %v1168_v51 = vrot.slane %v1167_v48, 2 }
 0xa78   : > { %v1187_v53 = vrot.slane %v1186_v49, 2 }
 0xa79   : > { %v1169_v55 = vadd.f32 %v1168_v51, %v1167_v48 }
 0xa7a   : > { %v1188_v56 = vmax.f32 %v1186_v49, %v1187_v53  ;;  %v3218_v53 = vld [vmem:[%s3404_s27 + $0x8] sm:$0xff]  ;;  %s2576_s27 = sshll.u32 %s352_s25, 4  ;;  %s3962_s27 = int_to_ptr.vmem [resolvable:$true] %s2576_s27 }
 0xa7b   : > { %v1170_v58 = vrot.slane %v1169_v55, 1  ;;  %s3219_s13 = scalar_lea.vmem %s3962_s27, 16  ;;  %p3226_p0 = scmp.lt.s32.totalorder %s3962_s27, %s3224_s16 }
 0xa7c   : > { %v1189_v59 = vrot.slane %v1188_v56, 1  ;;  %p3220_p11 = scmp.ne.s32.totalorder %s3962_s27, %s3219_s13  ;;  %p3227_p1 = scmp.lt.s32.totalorder %s3225_s22, %s3219_s13 }
 0xa7d   : > { %v1171_v2 = vadd.f32 %v1170_v58, %v1169_v55  ;;  %v1497_v55 = vrot.slane %v2701_v4, %v3467_v52 }
 0xa7e   : > { %v1190_v5 = vmax.f32 %v1188_v56, %v1189_v59  ;;  %p3221_p12 = pnand %p3220_p11, %p3377_p5  ;;  %p3228_p2 = por %p3227_p1, %p3226_p0 }
 0xa7f   : > { %v1172_v7 = vmul.f32 0.25, %v1171_v2 }
 0xa80   : > { %v3633_v32 = vadd.f32 %v1190_v5, %v790_v24  ;;  %p3222_p13 = pneg %p3221_p12 }
 0xa81   : > { %v3635_v8 = vadd.f32 %v1172_v7, %v772_v6 }
 0xa82   : > { %p3229_p3 = pnand %p3228_p2, %p3222_p13 }
 0xac3   : > { %v2996_v9 = vpop.f32.mrb[6].mxu0 }
 0xac4   : > { %v1265_v10 = vpop.f32.mrb[7].mxu0  ;;  %v1275_v11 = vmax.f32 %v2996_v9, 1.0 }
 0xac5   : > { %v1274_v12 = vmax.f32 %v1265_v10, 1.0 }
 0xac7   : > { %3210 = vrsqrt.f32 %v1274_v12 }
 0xac8   : > { %3212 = vrsqrt.f32 %v1275_v11 }
 0xad1   : > { %v3211_v13 = vpop.eup %3210 }
 0xad2   : > { %v1278_v15 = vmul.f32 %v3211_v13, %v3600_v18  ;;  %v3213_v16 = vpop.eup %3212 }
 0xad3   : > { %v1279_v17 = vmul.f32 %v3213_v16, %v3596_v14 }
 0xad4   : > { %1339 = vperm.xlu0 %3114, %v1278_v15  }
 0xad8   : > { %1344 = vperm.xlu0 %3114, %v1279_v17  }
 0xb45   : > { %v1330_v19 = vpop.f32.mrb[16].mxu1 }
 0xb46   : > { %v3003_v20 = vpop.f32.mrb[17].mxu1 }
 0xb47   : > { %v1333_v21 = vpop.f32.mrb[18].mxu1 }
 0xb48   : > { %v3004_v0 = vpop.f32.mrb[19].mxu1 }
 0xb53   : > { %v1340_v22 = vpop.permute.xlu0 %1339 }
 0xb54   : > { %v1347_v30 = vmul.f32 %v1340_v22, %v1330_v19 }
 0xb57   : > { %v1345_v26 = vpop.permute.xlu0 %1344 }
 0xb58   : > { %v1348_v33 = vmul.f32 %v1345_v26, %v1333_v21 }
 0xb5a   : > { %v1349_v34 = vpack.c.bf16 %v1348_v33, %v1347_v30 }
 0xb5c   : > { %3006 = vmatpush3.bf16.msra.mxu0 %v1349_v34  ;;  %v3122_v34 = vld [vmem:[%s4007_s5 + $0x10] sm:$0xff]  }
 0xb5d   : > { %3019 = vmatpush3.bf16.msra.mxu1 %v3122_v34  ;;  %v3148_v34 = vld [vmem:[%s4007_s5 + $0x108] sm:$0xff]  }
 0xb5e   : > { %3020 = vmatprep.subr.bf16.mxu1 %v3284_v1 }
 0xb5f   : > { %3008 = vmatmul.mubr.msk.bf16.vlgmr.msra.gmra.mrb[12].mxu0 %vm378_vm0, %v3430_v25  ;;  %v1406_v25 = vrot.slane %v2701_v4, %v3446_v31  ;;  %v3123_v4 = vld [vmem:[%s4007_s5] sm:$0xff]  }
 0xb60   : > { %3015 = vmatprep.mubr.msk.f32.mxu0 %vm378_vm0, %v3410_v3 }
 0xc32   : > { %v1384_v37 = vpop.f32.mrb[12].mxu0 }
 0xc33   : > { %v1391_v38 = vmul.f32 %v1384_v37, %v1340_v22  ;;  %v3009_v39 = vpop.f32.mrb[13].mxu0  ;;  %v3125_v37 = vld [vmem:[%s4007_s5 + $0x8] sm:$0xff]  }
 0xc34   : > { %v1387_v42 = vpop.f32.mrb[14].mxu0  ;;  %v3128_v39 = vld [vmem:[%s4007_s5 + $0xe0] sm:$0xff]  }
 0xc35   : > { %v1397_v29 = vadd.f32 %v1396_v35, %v1391_v38  ;;  %v1392_v43 = vmul.f32 %v1387_v42, %v1345_v26  ;;  %v3010_v44 = vpop.f32.mrb[15].mxu0  ;;  %v3126_v38 = vld [vmem:[%s4007_s5 + $0x60] sm:$0xff]  }
 0xc37   : > { %v1399_v36 = vmax.f32 %v1397_v29, 0.0  ;;  %v1398_v45 = vadd.f32 %v1396_v35, %v1392_v43  ;;  %v3124_v35 = vld [vmem:[%s4007_s5 + $0x18] sm:$0xff]   ;;  %v3287_v43 = vmov 1966171168  }
 0xc38   : > { %3021 = vmatpush3.bf16.msra.mxu1 %v3124_v35  ;;  %v1844_v44 = vunpack.c.l.s4 %v3287_v43  ;;  %v3147_v35 = vld [vmem:[%s4007_s5 + $0x48] sm:$0xff]   ;;  %v3153_v43 = vld [vmem:[%s4007_s5 + $0xd0] sm:$0xff]  }
 0xc39   : > { %v1400_v23 = vmax.f32 %v1398_v45, 0.0  ;;  %v3649_v3 = vmul.f32 %v3600_v18, %v1399_v36  ;;  %2841 = vmatprep.subr.bf16.mxu1 %v3126_v38  ;;  %v3150_v38 = vld [vmem:[%s4007_s5 + $0x90] sm:$0xff]  }
 0xc3b   : > { %v1407_v46 = vmul.f32 %v1406_v25, %v3649_v3  ;;  %v3653_v28 = vmul.f32 %v3596_v14, %v1400_v23 }
 0xc3d   : > { %v1409_v47 = vsel %vm477_vm2, %v1407_v46, 0.0  ;;  %v1408_v41 = vmul.f32 %v1406_v25, %v3653_v28 }
 0xc3e   : > { %1410 = vadd.xlane.f32.xlu1 %v1409_v47 }
 0xc3f   : > { %v1412_v48 = vsel %vm477_vm2, %v1408_v41, 0.0 }
 0xc40   : > { %1413 = vadd.xlane.f32.xlu0 %v1412_v48  ;;  %v1845_v48 = vunpack.c.0.s8 %v1844_v44  ;;  %v3154_v44 = vld [vmem:[%s4007_s5 + $0x98] sm:$0xff]  }
 0xccb   : > { %v1411_v40 = vpop.xlane.xlu1 %1410 }
 0xccc   : > { %v1415_v49 = vmul.f32 %v1411_v40, %v1278_v15 }
 0xccd   : > { %v1414_v31 = vpop.xlane.xlu0 %1413 }
 0xcce   : > { %v1416_v50 = vmul.f32 %v1414_v31, %v1279_v17 }
 0xcd0   : > { %v3066_v51 = vpack.c.bf16 %v1416_v50, %v1415_v49  ;;  %v3715_v50 = vsub.s32 %v1845_v48, %v3436_v27 }
 0xcd2   : > { %3067 = vmatprep.subr.bf16.mxu0 %v3066_v51 }
 0xcd3   : > { %3069 = vmatpush3.bf16.msra.mxu0 %v3066_v51 }
 0xcd4   : > { %3026 = vmatprep.subr.bf16.mxu0 %v3284_v1 }
 0xcd6   : > { %3016 = vmatmul.mubr.msk.f32.vlgmr.msra.gmra.mrb[16].mxu0 %vm378_vm0, %v3218_v53  ;;  %v3717_v53 = vld [vmem:[%s366_s14] sm:$0xff]  ;;  %s2564_s14 = scalar_lea.sflag [#allocation3], %s351_s17 }
 0xcd7   : > { %3030 = vmatprep.mubr.msk.bf16.mxu0 %vm3285_vm1, %v3284_v1  ;;  %3027 = vmatpush3.bf16.msra.mxu0 %v3123_v4  ;;  %v1842_v4 = vcombine.high %v3717_v53, %v3717_v53 }
 0xcd8   : > { %3028 = vmatprep.subr.bf16.mxu0 %v3284_v1 }
 0xcdb   : > { %3029 = vmatpush3.bf16.msra.mxu0 %v3125_v37  ;;  %v3149_v37 = vld [vmem:[%s4007_s5 + $0xc8] sm:$0xff]  }
 0xcdc   : > { %2863 = vmatprep.subr.bf16.mxu0 %v3128_v39  ;;  %v3152_v39 = vld [vmem:[%s4007_s5 + $0x110] sm:$0xff]  }
 0xda9   : > { %v3017_v57 = vpop.f32.mrb[16].mxu0 }
 0xdaa   : > { %v1493_v56 = vmul.f32 %v3017_v57, %v1279_v17  ;;  %v1483_v54 = vpop.f32.mrb[17].mxu0 }
 0xdab   : > { %v1492_v58 = vmul.f32 %v1483_v54, %v1278_v15  ;;  %v3721_v54 = vrot.slane %v3717_v53, %v3715_v50  ;;  %v3163_v53 = vld [vmem:[%s4007_s5 + $0x128] sm:$0xff]  }
 0xdac   : > { %v1499_v59 = vadd.f32 %v1497_v55, %v1493_v56 }
 0xdad   : > { %v1498_v2 = vadd.f32 %v1497_v55, %v1492_v58 }
 0xdae   : > { %v1501_v24 = vsel %vm1175_vm8, %v1499_v59, -1e+30  ;;  %3214 = vtanh.f32 %v1499_v59 }
 0xdaf   : > { %1509 = vperm.xlu1 %3115, %v1501_v24   ;;  %v1500_v5 = vsel %vm1174_vm10, %v1498_v2, -1e+30  ;;  %3216 = vtanh.f32 %v1498_v2 }
 0xdb0   : > { %1504 = vperm.xlu0 %3114, %v1500_v5   ;;  %v1857_v5 = vcombine.high %v3721_v54, %v3721_v54 }
 0xdb8   : > { %v3215_v21 = vpop.eup %3214 }
 0xdb9   : > { %v3217_v61 = vpop.eup %3216 }
 0xe2e   : > { %v1510_v6 = vpop.permute.xlu1 %1509 }
 0xe2f   : > { %v1513_v7 = vmul.f32 %v3480_v62, %v1510_v6  ;;  %v1505_v9 = vpop.permute.xlu0 %1504 }
 0xe30   : > { %v1512_v52 = vmul.f32 %v3483_v63, %v1505_v9 }
 0xe31   : > { %v1515_v10 = vsel %vm378_vm0, %v1513_v7, 0.0 }
 0xe32   : > { %v1514_v11 = vsel %vm378_vm0, %v1512_v52, 0.0  ;;  %v1879_v52 = vrot.slane %v1857_v5, %v3715_v50  ;;  %v3173_v5 = vld [vmem:[%s4007_s5 + $0x1b8] sm:$0xff]  }
 0xe33   : > { %v1516_v12 = vadd.f32 %v1515_v10, %v1514_v11  ;;  %v3127_v11 = vld [vmem:[%s4007_s5 + $0x20] sm:$0xff]  }
 0xe35   : > { %v1517_v13 = vrot.slane %v1516_v12, 4 }
 0xe37   : > { %v1518_v15 = vadd.f32 %v1517_v13, %v1516_v12  ;;  %v3129_v13 = vld [vmem:[%s4007_s5 + $0xa0] sm:$0xff]  }
 0xe39   : > { %v1519_v14 = vrot.slane %v1518_v15, 2 }
 0xe3b   : > { %v1520_v16 = vadd.f32 %v1519_v14, %v1518_v15  ;;  %v3130_v15 = vld [vmem:[%s4007_s5 + $0x68] sm:$0xff]  }
 0xe3d   : > { %v1521_v17 = vrot.slane %v1520_v16, 1 }
 0xe3f   : > { %v1522_v19 = vadd.f32 %v1521_v17, %v1520_v16  ;;  %v3131_v16 = vld [vmem:[%s4007_s5 + $0x28] sm:$0xff]  }
 0xe40   : > { %v3133_v17 = vld [vmem:[%s4007_s5 + $0xa8] sm:$0xff]  }
 0xe41   : > { %vm1525_vm11 = vcmp.eq.f32.partialorder %v1522_v19, %v1505_v9  ;;  %vm1524_vm12 = vcmp.gt.f32.partialorder %v1522_v19, %v1510_v6  ;;  %vm1526_vm13 = vcmp.eq.f32.partialorder %v1522_v19, %v1510_v6  ;;  %vm1523_vm15 = vcmp.gt.f32.partialorder %v1522_v19, %v1505_v9  ;;  %v3134_v19 = vld [vmem:[%s4007_s5 + $0x70] sm:$0xff]  }
 0xe42   : > { %vm1528_vm14 = vmand %vm1526_vm13, %vm726_vm5 }
 0xe43   : > { %vm1530_vm3 = vmor %vm1524_vm12, %vm1528_vm14 }
 0xe44   : > { %v2713_v62 = vsel %vm1530_vm3, 1.0, %v3284_v1  ;;  %vm1527_vm4 = vmand %vm1525_vm11, %vm725_vm9 }
 0xe45   : > { %v1538_v63 = vsel %vm378_vm0, %v2713_v62, 0.0  ;;  %vm1529_vm6 = vmor %vm1523_vm15, %vm1527_vm4  ;;  %v3136_v62 = vld [vmem:[%s4007_s5 + $0xf0] sm:$0xff]  }
 0xe46   : > { %1539 = vadd.xlane.f32.xlu0 %v1538_v63  ;;  %v2712_v18 = vsel %vm1529_vm6, 1.0, %v3284_v1  ;;  %v3135_v63 = vld [vmem:[%s4007_s5 + $0x30] sm:$0xff]  }
 0xe47   : > { %v1535_v20 = vsel %vm378_vm0, %v2712_v18, 0.0  ;;  %v3137_v18 = vld [vmem:[%s4007_s5 + $0xb0] sm:$0xff]  }
 0xe48   : > { %1536 = vadd.xlane.f32.xlu1 %v1535_v20  ;;  %v3138_v20 = vld [vmem:[%s4007_s5 + $0x78] sm:$0xff]  }
 0xed3   : > { %v1540_v60 = vpop.xlane.xlu0 %1539 }
 0xed4   : > { %vm1542_vm5 = vcmp.lt.f32.partialorder %v1540_v60, 2.0  ;;  %v3140_v60 = vld [vmem:[%s4007_s5 + $0xf8] sm:$0xff]  }
 0xed5   : > { %v2715_v0 = vsel %vm1542_vm5, 1.0, %v3284_v1  ;;  %v1537_v22 = vpop.xlane.xlu1 %1536 }
 0xed6   : > { %v1550_v26 = vmul.f32 %v3215_v21, %v2715_v0  ;;  %vm1541_vm7 = vcmp.lt.f32.partialorder %v1537_v22, 2.0  ;;  %vm1575_vm9 = vcmp.gt.f32.partialorder %v2715_v0, 0.0  ;;  %v3139_v21 = vld [vmem:[%s4007_s5 + $0x38] sm:$0xff]   ;;  %v3142_v22 = vld [vmem:[%s4007_s5 + $0x80] sm:$0xff]  }
 0xed7   : > { %v2714_v30 = vsel %vm1541_vm7, 1.0, %v3284_v1  ;;  %v3141_v0 = vld [vmem:[%s4007_s5 + $0xb8] sm:$0xff]  }
 0xed8   : > { %v1549_v33 = vmul.f32 %v3217_v61, %v2714_v30  ;;  %1558 = vperm.xlu1 %3115, %v1550_v26   ;;  %vm1574_vm8 = vcmp.gt.f32.partialorder %v2714_v30, 0.0  ;;  %v3144_v26 = vld [vmem:[%s4007_s5 + $0x100] sm:$0xff]  }
 0xed9   : > { %v3143_v61 = vld [vmem:[%s4007_s5 + $0x40] sm:$0xff]  }
 0xeda   : > { %1553 = vperm.xlu0 %3114, %v1549_v33   ;;  %v3145_v30 = vld [vmem:[%s4007_s5 + $0xc0] sm:$0xff]   ;;  %v3146_v33 = vld [vmem:[%s4007_s5 + $0x88] sm:$0xff]  }
 0xf57   : > { %v1559_v42 = vpop.permute.xlu1 %1558 }
 0xf58   : > { %v1562_v29 = vmul.f32 %v1559_v42, %v3653_v28  ;;  %v3805_v42 = vrot.slane %v1842_v4, %v3715_v50 }
 0xf59   : > { %v1554_v36 = vpop.permute.xlu0 %1553 }
 0xf5a   : > { %v1561_v45 = vmul.f32 %v1554_v36, %v3649_v3  ;;  %v1564_v25 = vsel %vm477_vm2, %v1562_v29, 0.0  ;;  %v1581_v23 = vsel %vm1575_vm9, %v1562_v29, -1e+30  ;;  %v3151_v29 = vld [vmem:[%s4007_s5 + $0x50] sm:$0xff]   ;;  %v3156_v36 = vld [vmem:[%s4007_s5 + $0x118] sm:$0xff]  }
 0xf5b   : > { %v1583_v46 = vsel %vm477_vm2, %v1581_v23, -inf  ;;  %v1865_v23 = vrot.slane %v3721_v54, %v3715_v50  ;;  %v3167_v54 = vld [vmem:[%s4007_s5 + $0x130] sm:$0xff]  }
 0xf5c   : > { %v1563_v47 = vsel %vm477_vm2, %v1561_v45, 0.0  ;;  %v1580_v41 = vsel %vm1574_vm8, %v1561_v45, -1e+30  ;;  %v1858_v45 = vcombine.high %v3805_v42, %v3805_v42 }
 0xf5d   : > { %v1582_v40 = vsel %vm477_vm2, %v1580_v41, -inf  ;;  %v1565_v28 = vadd.f32 %v1564_v25, %v1563_v47  ;;  %v3155_v25 = vld [vmem:[%s4007_s5 + $0x58] sm:$0xff]   ;;  %v3158_v47 = vld [vmem:[%s4007_s5 + $0x160] sm:$0xff]  }
 0xf5e   : > { %v1584_v31 = vmax.f32 %v1582_v40, %v1583_v46  ;;  %v3157_v46 = vld [vmem:[%s4007_s5 + $0xd8] sm:$0xff]   ;;  %v3160_v41 = vld [vmem:[%s4007_s5 + $0x1e0] sm:$0xff]   ;;  %v1886_v48 = vrot.slane %v1858_v45, %v3715_v50 }
 0xf5f   : > { %v1566_v3 = vrot.slane %v1565_v28, 4  ;;  %v3159_v40 = vld [vmem:[%s4007_s5 + $0x120] sm:$0xff]  }
 0xf60   : > { %v1585_v49 = vrot.slane %v1584_v31, 4 }
 0xf61   : > { %v1567_v51 = vadd.f32 %v1566_v3, %v1565_v28  ;;  %v1887_v28 = vcombine.high %v1865_v23, %v1865_v23  ;;  %v3162_v3 = vld [vmem:[%s4007_s5 + $0x168] sm:$0xff]  }
 0xf62   : > { %v1586_v55 = vmax.f32 %v1584_v31, %v1585_v49  ;;  %v3161_v31 = vld [vmem:[%s4007_s5 + $0x1a0] sm:$0xff]   ;;  %v3164_v49 = vld [vmem:[%s4007_s5 + $0x1e8] sm:$0xff]  }
 0xf63   : > { %v1568_v57 = vrot.slane %v1567_v51, 2 }
 0xf64   : > { %v1587_v56 = vrot.slane %v1586_v55, 2 }
 0xf65   : > { %v1569_v58 = vadd.f32 %v1568_v57, %v1567_v51  ;;  %v1890_v51 = vcombine.high %v1886_v48, %v1886_v48  ;;  %v3166_v57 = vld [vmem:[%s4007_s5 + $0x170] sm:$0xff]  }
 0xf66   : > { %v1588_v59 = vmax.f32 %v1586_v55, %v1587_v56  ;;  %v3165_v55 = vld [vmem:[%s4007_s5 + $0x1a8] sm:$0xff]   ;;  %v3168_v56 = vld [vmem:[%s4007_s5 + $0x1f0] sm:$0xff]  }
 0xf67   : > { %v1570_v2 = vrot.slane %v1569_v58, 1 }
 0xf68   : > { %v1589_v24 = vrot.slane %v1588_v59, 1 }
 0xf69   : > { %v1571_v6 = vadd.f32 %v1570_v2, %v1569_v58  ;;  %v3169_v58 = vld [vmem:[%s4007_s5 + $0x1b0] sm:$0xff]   ;;  %v3172_v2 = vld [vmem:[%s4007_s5 + $0x1f8] sm:$0xff]  }
 0xf6a   : > { %v1590_v27 = vmax.f32 %v1588_v59, %v1589_v24  ;;  %v3170_v59 = vld [vmem:[%s4007_s5 + $0x178] sm:$0xff]  }
 0xf6b   : > { %v1572_v7 = vmul.f32 0.5, %v1571_v6  ;;  %v3171_v24 = vld [vmem:[%s4007_s5 + $0x138] sm:$0xff]   ;;  %v3174_v6 = vld [vmem:[%s4007_s5 + $0x180] sm:$0xff]  }
 0xf6c   : > { %v1591_v9 = vadd.f32 %v1590_v27, %v3633_v32  ;;  %v3132_v32 = vld [vmem:[%s4007_s5 + $0xe8] sm:$0xff]   ;;  %v3176_v27 = vld [vmem:[%s4007_s5 + $0x200] sm:$0xff]  }
 0xf6d   : > { %v1573_v10 = vadd.f32 %v1572_v7, %v3635_v8  ;;  %v1889_v8 = vcombine.high %v1879_v52, %v1879_v52  ;;  %v3175_v7 = vld [vmem:[%s4007_s5 + $0x140] sm:$0xff]  }
 0xf6e   : > { %v1597_v12 = vpack.c.bf16 %v1591_v9, %v1591_v9  ;;  %v3177_v9 = vld [vmem:[%s4007_s5 + $0x1c0] sm:$0xff]  }
 0xf6f   : > { %v1592_v14 = vpack.c.bf16 %v1573_v10, %v1573_v10  ;;  %v3180_v10 = vld [vmem:[%s4007_s5 + $0x208] sm:$0xff]  }
 0xf70   : > { %3023 = vmatmul.mubr.msk.bf16.vlgmr.msra.gmra.mrb[20].mxu1 %vm477_vm2, %v1597_v12  ;;  %v3181_v12 = vld [vmem:[%s4007_s5 + $0x1c8] sm:$0xff]  }
 0xf71   : > { %2842 = vmatpush3.bf16.msra.mxu1 %v3127_v11  ;;  %3031 = vmatmul.mubr.msk.bf16.vlgmr.msra.gmra.mrb[20].mxu0 %vm477_vm2, %v1592_v14  ;;  %v3179_v11 = vld [vmem:[%s4007_s5 + $0x148] sm:$0xff]   ;;  %v3183_v14 = vld [vmem:[%s4007_s5 + $0x150] sm:$0xff]  }
 0xf72   : > { %2864 = vmatpush3.bf16.msra.mxu0 %v3129_v13  ;;  %2843 = vmatprep.subr.bf16.mxu1 %v3130_v15  ;;  %v3182_v13 = vld [vmem:[%s4007_s5 + $0x190] sm:$0xff]  }
 0xf73   : > { %2865 = vmatprep.subr.bf16.mxu0 %v3132_v32  ;;  %2315 = vmatprep.mubr.bf16.mxu1 %v1879_v52  ;;  %v3178_v52 = vld [vmem:[%s4007_s5 + $0x188] sm:$0xff]   ;;  %v3184_v15 = vld [vmem:[%s4007_s5 + $0x210] sm:$0xff]  }
 0xf74   : > { %2355 = vmatprep.mubr.bf16.mxu0 %v1889_v8  ;;  %v3185_v32 = vld [vmem:[%s4007_s5 + $0x1d0] sm:$0xff]   ;;  %v3186_v8 = vld [vmem:[%s4007_s5 + $0x198] sm:$0xff]  }
 0xf75   : > { %2844 = vmatpush3.bf16.msra.mxu1 %v3131_v16  ;;  %v3188_v16 = vld [vmem:[%s4007_s5 + $0x218] sm:$0xff]  }
 0xf76   : > { %2866 = vmatpush3.bf16.msra.mxu0 %v3133_v17  ;;  %2845 = vmatprep.subr.bf16.mxu1 %v3134_v19  ;;  %v3187_v17 = vld [vmem:[%s4007_s5 + $0x158] sm:$0xff]   ;;  %v1872_v19 = vrot.slane %v3805_v42, %v3715_v50  ;;  %v3191_v50 = vld [vmem:[%s4008_s6] sm:$0xff]  }
 0xf77   : > { %2867 = vmatprep.subr.bf16.mxu0 %v3136_v62  ;;  %v3190_v62 = vld [vmem:[%s4007_s5 + $0x1d8] sm:$0xff]  }
 0xf79   : > { %2846 = vmatpush3.bf16.msra.mxu1 %v3135_v63  ;;  %v1888_v63 = vcombine.high %v1872_v19, %v1872_v19 }
 0xf7a   : > { %2868 = vmatpush3.bf16.msra.mxu0 %v3137_v18  ;;  %2847 = vmatprep.subr.bf16.mxu1 %v3138_v20  ;;  %v3192_v18 = vld [vmem:[%s4008_s6 + $0x8] sm:$0xff]  }
 0xf7b   : > { %2869 = vmatprep.subr.bf16.mxu0 %v3140_v60 }
 0xf7d   : > { %2848 = vmatpush3.bf16.msra.mxu1 %v3139_v21 }
 0xf7e   : > { %2870 = vmatpush3.bf16.msra.mxu0 %v3141_v0  ;;  %2849 = vmatprep.subr.bf16.mxu1 %v3142_v22 }
 0xf7f   : > { %2871 = vmatprep.subr.bf16.mxu0 %v3144_v26 }
 0xf81   : > { %2850 = vmatpush3.bf16.msra.mxu1 %v3143_v61 }
 0xf82   : > { %2872 = vmatpush3.bf16.msra.mxu0 %v3145_v30  ;;  %2851 = vmatprep.subr.bf16.mxu1 %v3146_v33 }
 0xf83   : > { %2873 = vmatprep.subr.bf16.mxu0 %v3148_v34 }
 0xf85   : > { %2852 = vmatpush3.bf16.msra.mxu1 %v3147_v35 }
 0xf86   : > { %2874 = vmatpush3.bf16.msra.mxu0 %v3149_v37  ;;  %2853 = vmatprep.subr.bf16.mxu1 %v3150_v38 }
 0xf87   : > { %2875 = vmatprep.subr.bf16.mxu0 %v3152_v39 }
 0xf89   : > { %2854 = vmatpush3.bf16.msra.mxu1 %v3151_v29 }
 0xf8a   : > { %2876 = vmatpush3.bf16.msra.mxu0 %v3153_v43  ;;  %2855 = vmatprep.subr.bf16.mxu1 %v3154_v44 }
 0xf8b   : > { %2877 = vmatprep.subr.bf16.mxu0 %v3156_v36 }
 0xf8d   : > { %2856 = vmatpush3.bf16.msra.mxu1 %v3155_v25 }
 0xf8e   : > { %2878 = vmatpush3.bf16.msra.mxu0 %v3157_v46  ;;  %2885 = vmatprep.subr.bf16.mxu1 %v3158_v47 }
 0xf8f   : > { %2907 = vmatprep.subr.bf16.mxu0 %v3160_v41 }
 0xf90   : > { %2316 = vmatmul.mubr.bf16.vlgmr.msra.gmra.mrb[24].mxu1 %v1865_v23 }
 0xf91   : > { %2886 = vmatpush3.bf16.msra.mxu1 %v3159_v40  ;;  %2356 = vmatmul.mubr.bf16.vlgmr.msra.gmra.mrb[24].mxu0 %v1887_v28 }
 0xf92   : > { %2908 = vmatpush3.bf16.msra.mxu0 %v3161_v31  ;;  %2887 = vmatprep.subr.bf16.mxu1 %v3162_v3 }
 0xf93   : > { %2909 = vmatprep.subr.bf16.mxu0 %v3164_v49  ;;  %2395 = vmatprep.mubr.bf16.mxu1 %v1886_v48  ;;  %v2444_v49 = vld [vmem:[%s4010_s8] sm:$0x1] }
 0xf94   : > { %2435 = vmatprep.mubr.bf16.mxu0 %v1890_v51 }
 0xf95   : > { %2888 = vmatpush3.bf16.msra.mxu1 %v3163_v53 }
 0xf96   : > { %2910 = vmatpush3.bf16.msra.mxu0 %v3165_v55  ;;  %2889 = vmatprep.subr.bf16.mxu1 %v3166_v57 }
 0xf97   : > { %2911 = vmatprep.subr.bf16.mxu0 %v3168_v56  ;;  %v3193_v56 = vld [vmem:[%s4009_s7] sm:$0xff]  }
 0xf99   : > { %2890 = vmatpush3.bf16.msra.mxu1 %v3167_v54  ;;  %v2452_v54 = vld [vmem:[%s4010_s8 + $0x1] sm:$0x1] }
 0xf9a   : > { %2912 = vmatpush3.bf16.msra.mxu0 %v3169_v58  ;;  %2891 = vmatprep.subr.bf16.mxu1 %v3170_v59 }
 0xf9b   : > { %2913 = vmatprep.subr.bf16.mxu0 %v3172_v2 }
 0xf9d   : > { %2892 = vmatpush3.bf16.msra.mxu1 %v3171_v24 }
 0xf9e   : > { %2914 = vmatpush3.bf16.msra.mxu0 %v3173_v5  ;;  %2893 = vmatprep.subr.bf16.mxu1 %v3174_v6 }
 0xf9f   : > { %2915 = vmatprep.subr.bf16.mxu0 %v3176_v27 }
 0xfa1   : > { %2894 = vmatpush3.bf16.msra.mxu1 %v3175_v7  ;;  %v2512_v7 = vld [vmem:[%s4010_s8 + $0x2] sm:$0x1] }
 0xfa2   : > { %2916 = vmatpush3.bf16.msra.mxu0 %v3177_v9  ;;  %2895 = vmatprep.subr.bf16.mxu1 %v3178_v52 }
 0xfa3   : > { %2917 = vmatprep.subr.bf16.mxu0 %v3180_v10 }
 0xfa5   : > { %2896 = vmatpush3.bf16.msra.mxu1 %v3179_v11 }
 0xfa6   : > { %2918 = vmatpush3.bf16.msra.mxu0 %v3181_v12  ;;  %2897 = vmatprep.subr.bf16.mxu1 %v3182_v13 }
 0xfa7   : > { %2919 = vmatprep.subr.bf16.mxu0 %v3184_v15 }
 0xfa9   : > { %2898 = vmatpush3.bf16.msra.mxu1 %v3183_v14 }
 0xfaa   : > { %2920 = vmatpush3.bf16.msra.mxu0 %v3185_v32  ;;  %2899 = vmatprep.subr.bf16.mxu1 %v3186_v8 }
 0xfab   : > { %2921 = vmatprep.subr.bf16.mxu0 %v3188_v16 }
 0xfad   : > { %2900 = vmatpush3.bf16.msra.mxu1 %v3187_v17 }
 0xfae   : > { %2922 = vmatpush3.bf16.msra.mxu0 %v3190_v62  ;;  %3034 = vmatprep.subr.bf16.mxu1 %v3284_v1 }
 0xfaf   : > { %3042 = vmatprep.subr.bf16.mxu0 %v3284_v1 }
 0xfb0   : > { %2396 = vmatmul.mubr.bf16.vlgmr.msra.gmra.mrb[28].mxu1 %v1872_v19 }
 0xfb1   : > { %2436 = vmatmul.mubr.bf16.vlgmr.msra.gmra.mrb[28].mxu0 %v1888_v63  ;;  %3038 = vmatprep.mubr.msk.bf16.mxu1 %vm3285_vm1, %v3284_v1 }
 0xfb2   : > { %3044 = vmatprep.mubr.msk.bf16.mxu0 %vm3285_vm1, %v3284_v1  ;;  %3035 = vmatpush3.bf16.msra.mxu1 %v3191_v50 }
 0xfb3   : > { %3036 = vmatprep.subr.bf16.mxu1 %v3284_v1  ;;  %3043 = vmatpush3.bf16.msra.mxu0 %v3193_v56 }
 0xfb6   : > { %3037 = vmatpush3.bf16.msra.mxu1 %v3192_v18 }
0x1043   : > { %v1651_v20 = vpop.f32.mrb[20].mxu1 }
0x1044   : > { %v3024_v60 = vpop.f32.mrb[21].mxu1  ;;  %v1706_v21 = vpop.f32.mrb[20].mxu0 }
0x1045   : > { %v1707_v0 = vadd.f32 %v1706_v21, %v1651_v20  ;;  %v1654_v22 = vpop.f32.mrb[22].mxu1  ;;  %v3032_v26 = vpop.f32.mrb[21].mxu0 }
0x1046   : > { %v3025_v61 = vpop.f32.mrb[23].mxu1  ;;  %v1709_v30 = vpop.f32.mrb[22].mxu0 }
0x1047   : > { %v3033_v33 = vpop.f32.mrb[23].mxu0 }
0x1063   : > { %v2857_v34 = vpop.f32.mrb[24].mxu1 }
0x1064   : > { %v2858_v4 = vpop.f32.mrb[25].mxu1  ;;  %v2879_v35 = vpop.f32.mrb[24].mxu0 }
0x1065   : > { %v2859_v37 = vadd.f32 %v2858_v4, %v2857_v34  ;;  %v2860_v38 = vpop.f32.mrb[26].mxu1  ;;  %v2880_v1 = vpop.f32.mrb[25].mxu0 }
0x1066   : > { %v2861_v39 = vpop.f32.mrb[27].mxu1  ;;  %v2881_v42 = vadd.f32 %v2880_v1, %v2879_v35  ;;  %v2882_v29 = vpop.f32.mrb[26].mxu0 }
0x1067   : > { %v2883_v43 = vpop.f32.mrb[27].mxu0 }
0x1068   : > { %v2358_v44 = vadd.f32 %v2881_v42, %v2859_v37 }
0x1083   : > { %v2901_v36 = vpop.f32.mrb[28].mxu1 }
0x1084   : > { %v2902_v45 = vpop.f32.mrb[29].mxu1  ;;  %v2923_v25 = vpop.f32.mrb[28].mxu0 }
0x1085   : > { %v2903_v23 = vadd.f32 %v2902_v45, %v2901_v36  ;;  %v2924_v46 = vpop.f32.mrb[29].mxu0  ;;  %v2904_v47 = vpop.f32.mrb[30].mxu1 }
0x1086   : > { %v2925_v41 = vadd.f32 %v2924_v46, %v2923_v25  ;;  %v2905_v48 = vpop.f32.mrb[31].mxu1  ;;  %v2926_v40 = vpop.f32.mrb[30].mxu0 }
0x1087   : > { %v2398_v28 = vadd.f32 %v2903_v23, %v2358_v44  ;;  %v2927_v31 = vpop.f32.mrb[31].mxu0 }
0x1089   : > { %v2438_v3 = vadd.f32 %v2925_v41, %v2398_v28 }
0x108b   : > { %v2443_v51 = vadd.f32 %v2438_v3, %v1707_v0 }
0x108d   : > { %v2445_v53 = vadd.f32 %v2444_v49, %v2443_v51 }
0x108f   : > { %v2446_v55 = vmax.f32 %v2445_v53, 0.0 }
0x1091   : > { %v2447_v57 = vpack.c.bf16 %v2446_v55, %v2446_v55 }
0x1093   : > { %3039 = vmatmul.mubr.msk.bf16.vlgmr.msra.gmra.mrb[32].mxu1 %vm477_vm2, %v2447_v57 }
0x1166   : > { %v2502_v58 = vpop.f32.mrb[32].mxu1 }
0x1167   : > { %v2503_v59 = vadd.f32 %v2502_v58, %v2452_v54  ;;  %v3040_v2 = vpop.f32.mrb[33].mxu1 }
0x1168   : > { %v2505_v24 = vpop.f32.mrb[34].mxu1 }
0x1169   : > { %v2508_v5 = vmax.f32 %v2503_v59, 0.0  ;;  %v3041_v6 = vpop.f32.mrb[35].mxu1 }
0x116b   : > { %v2509_v27 = vpack.c.bf16 %v2508_v5, %v2508_v5 }
0x116d   : > { %3045 = vmatmul.mubr.msk.bf16.vlgmr.msra.gmra.mrb[32].mxu0 %vm378_vm0, %v2509_v27 }
0x1240   : > { %v2556_v9 = vpop.f32.mrb[32].mxu0 }
0x1241   : > { %v2557_v52 = vadd.f32 %v2556_v9, %v2512_v7  ;;  %v3046_v10 = vpop.f32.mrb[33].mxu0 }
0x1242   : > { %v2559_v11 = vpop.f32.mrb[34].mxu0 }
0x1243   : > { %2562 = vst [vmem:[%s352_s25] sm:$0x1] %v2557_v52  ;;  %v3047_v12 = vpop.f32.mrb[35].mxu0 }
0x1244   : > { %3232 = shalt.err (!%p3229_p3)
}
0x1245   : > { %s3233_s17 = scalar_lea.hbm %s3960_s29, 16  ;;  %s3237_s25 = scalar_lea.hbm %s4011_s9, 64 }
0x1246   : > { %p3234_p4 = scmp.ne.s32.totalorder %s3960_s29, %s3233_s17  ;;  %p3238_p9 = scmp.lt.u32.totalorder %s3960_s29, %s4011_s9 }
0x1247   : > { %p3239_p10 = scmp.lt.u32.totalorder %s3237_s25, %s3233_s17  ;;  %p3241_p12 = scmp.lt.u32.totalorder %s3233_s17, %s3960_s29 }
0x1248   : > { %p3235_p7 = pnand %p3234_p4, %p3377_p5 }
0x1249   : > { %p3240_p11 = por %p3239_p10, %p3238_p9 }
0x124a   : > { %p3236_p8 = pneg %p3235_p7 }
0x124b   : > { %p3242_p13 = por %p3241_p12, %p3240_p11 }
0x124d   : > { %p3243_p0 = pnand %p3242_p13, %p3236_p8 }
0x124f   : > { %3246 = shalt.err (!%p3243_p0)
}
0x1250   : > { %3070 = dma.vmem_to_hbm [thread:$0]  (%p3377_p5), %s3962_s27, 16, %s3960_s29, %s2564_s14  }
0x1251 PF: > { %p3076_p1 = scmp.ge.s32.totalorder %s3281_s12, 2  ;;  %s2588_s13 = sand.u32 1, %s3269_s30  }
0x1252   : > { %s2589_s21 = scalar_lea.sflag [#allocation3], %s2588_s13 }
0x1253   : > { %p3073_p2 = pnand %p3076_p1, %p3381_p6 }
0x1255   : > { %3264 = dma.done.wait (!%p3073_p2), %s2589_s21, 16  }
0x1256   : > { %3266 = vsyncadd (!%p3073_p2), %s2589_s21, 4294967280  ;;  %p19_p3 = scmp.ge.s32.totalorder %s3364_s15, 6   ;;  %s4014_s30 = smov %s3273_s10 }
0x1257   : > { %s4015_s10 = smov %s3277_s11  ;;  %s4016_s11 = smov %s3375_s18 }
0x1258   : > { %s4017_s12 = smov %s3364_s15  ;;  %21 = sbr.rel (!%p19_p3) target bundleno = 3 (0x3), region = 101 }
0x125f   :  { %2593 = vsyncpa [#allocation3], 1 }
0x1260   :  { %2595 = vsyncpa [#allocation3 + $0x1], 1 }

</bundles_post_ra>
